<compile_context>
chip_gen: v7x
topology: tpu7x:2x2x1
jax: 0.10.0
libtpu: 0.0.40
codegen_flags: <defaults>
</compile_context>

<pallas_src>
import functools

import jax
import jax.numpy as jnp
from jax.experimental import pallas as pl
from jax.experimental.pallas import tpu as pltpu


def _lstm_fused_kernel(T, B,
                       tok_ref, ew_ref, b_ref,
                       whh_i_ref, whh_f_ref, whh_g_ref, whh_o_ref,
                       hseq_ref, hn_ref, cn_ref,
                       gxi, gxf, gxg, gxo):
    """Single-invocation fused kernel.

    Shapes (batch already padded, time-major, time-flattened in the wrapper):
      tok_ref:  (T*B, 1)   int32   time-major token ids (row r = t*B + b)
      ew_ref:   (Vp, 4H)   f32     embedding @ W_ih (vocab padded to Vp)
      b_ref:    (1, 4H)    f32     b_ih + b_hh
      whh_*:    (H, H)     f32     per-gate recurrent weights (W_hh.T split along gates)
      hseq_ref: (T*B, H)           output hidden sequence (time-major flat)
      hn_ref/cn_ref: (B, H)        final states
      gxi..gxo: (T*B, H)   f32     VMEM scratch: lane-aligned per-gate input projections
    """
    H = whh_i_ref.shape[0]
    Vp = ew_ref.shape[0]
    TB = T * B

    # ---- fused embedding gather + input projection, hoisted out of the recurrence ----
    # one_hot(tokens) @ (E @ W_ih)  ==  Embedding(tokens) @ W_ih   (exact row selection)
    tok = tok_ref[...]                                                  # (T*B, 1) int32
    vocab_iota = jax.lax.broadcasted_iota(jnp.int32, (TB, Vp), 1)
    onehot = (tok == vocab_iota).astype(jnp.float32)                    # (T*B, Vp)
    gx = jnp.dot(onehot, ew_ref[...],
                 preferred_element_type=jnp.float32) + b_ref[...]       # (T*B, 4H)

    # ---- pre-split the gates ONCE into lane-aligned slabs (off the serial chain) ----
    gxi[...] = gx[:, 0 * H:1 * H]
    gxf[...] = gx[:, 1 * H:2 * H]
    gxg[...] = gx[:, 2 * H:3 * H]
    gxo[...] = gx[:, 3 * H:4 * H]

    w_i = whh_i_ref[...]
    w_f = whh_f_ref[...]
    w_g = whh_g_ref[...]
    w_o = whh_o_ref[...]

    def step(t, carry):
        h, c = carry
        row = pl.multiple_of(t * B, B)
        # Four (B,H)x(H,H) recurrent matmuls — each gate lands directly on lanes 0:H,
        # so no XLU lane extraction sits on the h_{t-1} -> h_t critical path.
        ri = jnp.dot(h, w_i, preferred_element_type=jnp.float32)
        rf = jnp.dot(h, w_f, preferred_element_type=jnp.float32)
        rg = jnp.dot(h, w_g, preferred_element_type=jnp.float32)
        ro = jnp.dot(h, w_o, preferred_element_type=jnp.float32)

        # PyTorch LSTM gate order: i, f, g, o. The four nonlinearities are mutually
        # independent, so they pipeline through the single EUP slot.
        i = jax.nn.sigmoid(gxi[pl.ds(row, B), :] + ri)
        f = jax.nn.sigmoid(gxf[pl.ds(row, B), :] + rf)
        g = jnp.tanh(gxg[pl.ds(row, B), :] + rg)
        o = jax.nn.sigmoid(gxo[pl.ds(row, B), :] + ro)

        c_new = f * c + i * g
        h_new = o * jnp.tanh(c_new)

        hseq_ref[pl.ds(row, B), :] = h_new        # single per-step store (lane-aligned)
        return (h_new, c_new)

    h0 = jnp.zeros((B, H), jnp.float32)
    c0 = jnp.zeros((B, H), jnp.float32)
    # hidden=None in the PyTorch module -> zero-initialized (h0, c0).
    h_n, c_n = jax.lax.fori_loop(0, T, step, (h0, c0), unroll=True)

    # Final states written exactly once (num_layers = 1).
    hn_ref[...] = h_n
    cn_ref[...] = c_n


@jax.jit
def agreement_model_forward(token_ids, params):
    """JAX wrapper reproducing Agreement_model.forward (LSTM variant). Fully jitted."""
    emb = params["embedding"]      # (V, E)
    wih = params["w_ih"]           # (E, 4H)  == weight_ih_l0.T
    whh = params["w_hh"]           # (H, 4H)  == weight_hh_l0.T
    b = params["b"]                # (1, 4H)  == b_ih + b_hh
    wout = params["w_out"]         # (H, O)   == output_layer.weight.T
    bout = params["b_out"]         # (1, O)

    B, T = token_ids.shape
    V, _ = emb.shape
    H = whh.shape[0]
    B_pad = ((B + 7) // 8) * 8             # pad batch to a full sublane group
    V_pad = ((V + 127) // 128) * 128       # pad vocab to a full lane group for the one-hot matmul

    # Precompute embedding @ W_ih (tiny, fused by XLA under this jit); pad vocab rows with zeros.
    ew = jnp.dot(emb.astype(jnp.float32), wih.astype(jnp.float32),
                 preferred_element_type=jnp.float32)                    # (V, 4H)
    ew = jnp.pad(ew, ((0, V_pad - V), (0, 0)))                          # (Vp, 4H)

    # Time-major, batch-padded token ids (row r = t*B_pad + b). Padded rows use token 0;
    # their hidden states are garbage but independent of real rows and sliced off below.
    tok = jnp.pad(token_ids.astype(jnp.int32), ((0, B_pad - B), (0, 0)))  # (B_pad, T)
    tok_tm = tok.T.reshape(T * B_pad, 1)                                  # (T*B_pad, 1)

    # Per-gate recurrent weights (split once, free under jit).
    whh = whh.astype(jnp.float32)
    whh_i = whh[:, 0 * H:1 * H]
    whh_f = whh[:, 1 * H:2 * H]
    whh_g = whh[:, 2 * H:3 * H]
    whh_o = whh[:, 3 * H:4 * H]

    kernel = functools.partial(_lstm_fused_kernel, T, B_pad)

    grid_spec = pltpu.PrefetchScalarGridSpec(
        num_scalar_prefetch=0,
        grid=(1,),                                            # single invocation
        in_specs=[
            pl.BlockSpec((T * B_pad, 1), lambda i: (0, 0)),   # token ids (time-major flat)
            pl.BlockSpec((V_pad, 4 * H), lambda i: (0, 0)),   # embedding @ W_ih
            pl.BlockSpec((1, 4 * H), lambda i: (0, 0)),       # bias (b_ih + b_hh)
            pl.BlockSpec((H, H), lambda i: (0, 0)),           # W_hh (i gate)
            pl.BlockSpec((H, H), lambda i: (0, 0)),           # W_hh (f gate)
            pl.BlockSpec((H, H), lambda i: (0, 0)),           # W_hh (g gate)
            pl.BlockSpec((H, H), lambda i: (0, 0)),           # W_hh (o gate)
        ],
        out_specs=[
            pl.BlockSpec((T * B_pad, H), lambda i: (0, 0)),   # hidden sequence, time-major flat
            pl.BlockSpec((B_pad, H), lambda i: (0, 0)),       # h_n
            pl.BlockSpec((B_pad, H), lambda i: (0, 0)),       # c_n
        ],
        scratch_shapes=[
            pltpu.VMEM((T * B_pad, H), jnp.float32),          # gx_i (lane-aligned)
            pltpu.VMEM((T * B_pad, H), jnp.float32),          # gx_f
            pltpu.VMEM((T * B_pad, H), jnp.float32),          # gx_g
            pltpu.VMEM((T * B_pad, H), jnp.float32),          # gx_o
        ],
    )

    h2d, hn, cn = pl.pallas_call(
        kernel,
        grid_spec=grid_spec,
        out_shape=(
            jax.ShapeDtypeStruct((T * B_pad, H), jnp.float32),
            jax.ShapeDtypeStruct((B_pad, H), jnp.float32),
            jax.ShapeDtypeStruct((B_pad, H), jnp.float32),
        ),
        compiler_params=pltpu.CompilerParams(
            dimension_semantics=("arbitrary",)),
    )(tok_tm, ew, b.astype(jnp.float32), whh_i, whh_f, whh_g, whh_o)

    # Post-glue (fused by XLA under this jit): un-flatten, drop batch padding, batch-major.
    h_last = jnp.transpose(h2d.reshape(T, B_pad, H)[:, :B], (1, 0, 2))    # (B, T, H)
    # Output Linear (O=2, lane-sparse) computed here instead of masked in-kernel stores.
    output = h_last @ wout + bout                                         # (B, T, O)
    h_n = hn[None, :B]                                                    # (1, B, H)
    c_n = cn[None, :B]                                                    # (1, B, H)
    attention_weights = None   # no attention flags set in this configuration
    return output, h_last, (h_n, c_n), attention_weights


def reference_forward(token_ids, params):
    """Pure-JAX reference (lax.scan LSTM) for correctness checking."""
    emb = params["embedding"]
    wih, whh, b = params["w_ih"], params["w_hh"], params["b"]
    wout, bout = params["w_out"], params["b_out"]
    B, T = token_ids.shape
    H = whh.shape[0]

    x = jnp.take(emb, token_ids, axis=0).transpose(1, 0, 2)   # (T, B, E)

    def step(carry, x_t):
        h, c = carry
        gates = x_t @ wih + h @ whh + b
        i = jax.nn.sigmoid(gates[:, 0 * H:1 * H])
        f = jax.nn.sigmoid(gates[:, 1 * H:2 * H])
        g = jnp.tanh(gates[:, 2 * H:3 * H])
        o = jax.nn.sigmoid(gates[:, 3 * H:4 * H])
        c = f * c + i * g
        h = o * jnp.tanh(c)
        return (h, c), h

    h0 = jnp.zeros((B, H), jnp.float32)
    (h_n, c_n), hs = jax.lax.scan(step, (h0, h0), x)
    h_last = jnp.transpose(hs, (1, 0, 2))                     # (B, T, H)
    output = h_last @ wout + bout
    return output, h_last, (h_n[None], c_n[None])


def make_params(key, vocab_size, embedding_size, hidden_size, output_size):
    ks = jax.random.split(key, 7)
    E, H, O, V = embedding_size, hidden_size, output_size, vocab_size
    scale = 0.1
    return {
        "embedding": scale * jax.random.normal(ks[0], (V, E), jnp.float32),
        "w_ih": scale * jax.random.normal(ks[1], (E, 4 * H), jnp.float32),
        "w_hh": scale * jax.random.normal(ks[2], (H, 4 * H), jnp.float32),
        "b": scale * jax.random.normal(ks[3], (1, 4 * H), jnp.float32),
        "w_out": scale * jax.random.normal(ks[4], (H, O), jnp.float32),
        "b_out": scale * jax.random.normal(ks[5], (1, O), jnp.float32),
    }


if __name__ == "__main__":
    # Small shapes consistent with the module: batch=2, seq=8, embed=32, hidden=32, vocab=50, out=2
    B, T = 2, 8
    VOCAB, EMB, HID, OUT = 50, 32, 32, 2

    key = jax.random.PRNGKey(0)
    k_tok, k_par = jax.random.split(key)
    token_ids = jax.random.randint(k_tok, (B, T), 0, VOCAB, dtype=jnp.int32)
    params = make_params(k_par, VOCAB, EMB, HID, OUT)

    output, h_last, (h_n, c_n), attn = agreement_model_forward(token_ids, params)
    jax.block_until_ready((output, h_last, h_n, c_n))

    # Correctness check against pure-JAX reference
    ref_out, ref_hlast, (ref_hn, ref_cn) = reference_forward(token_ids, params)
    assert jnp.allclose(output, ref_out, atol=1e-5), "output mismatch"
    assert jnp.allclose(h_last, ref_hlast, atol=1e-5), "h_last mismatch"
    assert jnp.allclose(h_n, ref_hn, atol=1e-5), "h_n mismatch"
    assert jnp.allclose(c_n, ref_cn, atol=1e-5), "c_n mismatch"
    assert attn is None

    print("KERNEL_OK")
</pallas_src>

<mosaic_0001>
module attributes {stable_mosaic.version = 11 : i64} {
  func.func @_lstm_fused_kernel(%arg0: i32, %arg1: memref<64x1xi32, #tpu.memory_space<vmem>>, %arg2: memref<128x128xf32, #tpu.memory_space<vmem>>, %arg3: memref<1x128xf32, #tpu.memory_space<vmem>>, %arg4: memref<32x32xf32, #tpu.memory_space<vmem>>, %arg5: memref<32x32xf32, #tpu.memory_space<vmem>>, %arg6: memref<32x32xf32, #tpu.memory_space<vmem>>, %arg7: memref<32x32xf32, #tpu.memory_space<vmem>>, %arg8: memref<64x32xf32, #tpu.memory_space<vmem>>, %arg9: memref<8x32xf32, #tpu.memory_space<vmem>>, %arg10: memref<8x32xf32, #tpu.memory_space<vmem>>, %arg11: memref<64x32xf32, #tpu.memory_space<vmem>>, %arg12: memref<64x32xf32, #tpu.memory_space<vmem>>, %arg13: memref<64x32xf32, #tpu.memory_space<vmem>>, %arg14: memref<64x32xf32, #tpu.memory_space<vmem>>) attributes {dimension_semantics = [#tpu.dimension_semantics<arbitrary>], iteration_bounds = array<i64: 1>, scalar_prefetch = 0 : i64, scratch_operands = 4 : i64, tpu.core_type = #tpu.core_type<tc>, window_params = [{pipeline_mode = #tpu.pipeline_mode<synchronous>, transform_indices = @transform_0, window_bounds = array<i64: 64, 1>}, {pipeline_mode = #tpu.pipeline_mode<synchronous>, transform_indices = @transform_1, window_bounds = array<i64: 128, 128>}, {pipeline_mode = #tpu.pipeline_mode<synchronous>, transform_indices = @transform_2, window_bounds = array<i64: 1, 128>}, {pipeline_mode = #tpu.pipeline_mode<synchronous>, transform_indices = @transform_3, window_bounds = array<i64: 32, 32>}, {pipeline_mode = #tpu.pipeline_mode<synchronous>, transform_indices = @transform_4, window_bounds = array<i64: 32, 32>}, {pipeline_mode = #tpu.pipeline_mode<synchronous>, transform_indices = @transform_5, window_bounds = array<i64: 32, 32>}, {pipeline_mode = #tpu.pipeline_mode<synchronous>, transform_indices = @transform_6, window_bounds = array<i64: 32, 32>}, {pipeline_mode = #tpu.pipeline_mode<synchronous>, transform_indices = @transform_7, window_bounds = array<i64: 64, 32>}, {pipeline_mode = #tpu.pipeline_mode<synchronous>, transform_indices = @transform_8, window_bounds = array<i64: 8, 32>}, {pipeline_mode = #tpu.pipeline_mode<synchronous>, transform_indices = @transform_9, window_bounds = array<i64: 8, 32>}]} {
    %c0 = arith.constant 0 : index
    %c0_0 = arith.constant 0 : index
    %0 = vector.load %arg1[%c0, %c0_0] : memref<64x1xi32, #tpu.memory_space<vmem>>, vector<64x1xi32>
    %1 = tpu.iota {dimensions = array<i32: 1>} : vector<64x128xi32>
    %2 = vector.broadcast %0 : vector<64x1xi32> to vector<64x128xi32>
    %3 = arith.cmpi eq, %2, %1 : vector<64x128xi32>
    %4 = arith.extui %3 : vector<64x128xi1> to vector<64x128xi32>
    %5 = arith.sitofp %4 : vector<64x128xi32> to vector<64x128xf32>
    %c0_1 = arith.constant 0 : index
    %c0_2 = arith.constant 0 : index
    %6 = vector.load %arg2[%c0_1, %c0_2] : memref<128x128xf32, #tpu.memory_space<vmem>>, vector<128x128xf32>
    %cst = arith.constant dense<0.000000e+00> : vector<64x128xf32>
    %7 = tpu.matmul %5, %6, %cst {dimension_numbers = #tpu.dot_dimension_numbers<[1], [0], [0], [1], [0, 0, 1, 1], [], []>} : vector<64x128xf32>, vector<128x128xf32>, vector<64x128xf32> -> vector<64x128xf32>
    %c0_3 = arith.constant 0 : index
    %c0_4 = arith.constant 0 : index
    %8 = vector.load %arg3[%c0_3, %c0_4] : memref<1x128xf32, #tpu.memory_space<vmem>>, vector<1x128xf32>
    %9 = vector.broadcast %8 : vector<1x128xf32> to vector<64x128xf32>
    %10 = arith.addf %7, %9 : vector<64x128xf32>
    %11 = vector.extract_strided_slice %10 {offsets = [0, 0], sizes = [64, 32], strides = [1, 1]} : vector<64x128xf32> to vector<64x32xf32>
    %c0_5 = arith.constant 0 : index
    %c0_6 = arith.constant 0 : index
    %12 = vector.load %arg11[%c0_5, %c0_6] : memref<64x32xf32, #tpu.memory_space<vmem>>, vector<64x32xf32>
    tpu.vector_store %arg11[%c0_5, %c0_6], %11 {strides = array<i32>} : memref<64x32xf32, #tpu.memory_space<vmem>>, vector<64x32xf32>,
    %13 = vector.extract_strided_slice %10 {offsets = [0, 32], sizes = [64, 32], strides = [1, 1]} : vector<64x128xf32> to vector<64x32xf32>
    %c0_7 = arith.constant 0 : index
    %c0_8 = arith.constant 0 : index
    %14 = vector.load %arg12[%c0_7, %c0_8] : memref<64x32xf32, #tpu.memory_space<vmem>>, vector<64x32xf32>
    tpu.vector_store %arg12[%c0_7, %c0_8], %13 {strides = array<i32>} : memref<64x32xf32, #tpu.memory_space<vmem>>, vector<64x32xf32>,
    %15 = vector.extract_strided_slice %10 {offsets = [0, 64], sizes = [64, 32], strides = [1, 1]} : vector<64x128xf32> to vector<64x32xf32>
    %c0_9 = arith.constant 0 : index
    %c0_10 = arith.constant 0 : index
    %16 = vector.load %arg13[%c0_9, %c0_10] : memref<64x32xf32, #tpu.memory_space<vmem>>, vector<64x32xf32>
    tpu.vector_store %arg13[%c0_9, %c0_10], %15 {strides = array<i32>} : memref<64x32xf32, #tpu.memory_space<vmem>>, vector<64x32xf32>,
    %17 = vector.extract_strided_slice %10 {offsets = [0, 96], sizes = [64, 32], strides = [1, 1]} : vector<64x128xf32> to vector<64x32xf32>
    %c0_11 = arith.constant 0 : index
    %c0_12 = arith.constant 0 : index
    %18 = vector.load %arg14[%c0_11, %c0_12] : memref<64x32xf32, #tpu.memory_space<vmem>>, vector<64x32xf32>
    tpu.vector_store %arg14[%c0_11, %c0_12], %17 {strides = array<i32>} : memref<64x32xf32, #tpu.memory_space<vmem>>, vector<64x32xf32>,
    %c0_13 = arith.constant 0 : index
    %c0_14 = arith.constant 0 : index
    %19 = vector.load %arg4[%c0_13, %c0_14] : memref<32x32xf32, #tpu.memory_space<vmem>>, vector<32x32xf32>
    %c0_15 = arith.constant 0 : index
    %c0_16 = arith.constant 0 : index
    %20 = vector.load %arg5[%c0_15, %c0_16] : memref<32x32xf32, #tpu.memory_space<vmem>>, vector<32x32xf32>
    %c0_17 = arith.constant 0 : index
    %c0_18 = arith.constant 0 : index
    %21 = vector.load %arg6[%c0_17, %c0_18] : memref<32x32xf32, #tpu.memory_space<vmem>>, vector<32x32xf32>
    %c0_19 = arith.constant 0 : index
    %c0_20 = arith.constant 0 : index
    %22 = vector.load %arg7[%c0_19, %c0_20] : memref<32x32xf32, #tpu.memory_space<vmem>>, vector<32x32xf32>
    %cst_21 = arith.constant 0.000000e+00 : f32
    %23 = vector.broadcast %cst_21 : f32 to vector<8x32xf32>
    %cst_22 = arith.constant 0.000000e+00 : f32
    %24 = vector.broadcast %cst_22 : f32 to vector<8x32xf32>
    %c0_i32 = arith.constant 0 : i32
    %c8_i32 = arith.constant 8 : i32
    %25 = arith.muli %c0_i32, %c8_i32 : i32
    %26 = tpu.assume_multiple %25, 8 : i32
    %cst_23 = arith.constant dense<0.000000e+00> : vector<8x32xf32>
    %27 = tpu.matmul %23, %19, %cst_23 {dimension_numbers = #tpu.dot_dimension_numbers<[1], [0], [0], [1], [0, 0, 1, 1], [], []>} : vector<8x32xf32>, vector<32x32xf32>, vector<8x32xf32> -> vector<8x32xf32>
    %cst_24 = arith.constant dense<0.000000e+00> : vector<8x32xf32>
    %28 = tpu.matmul %23, %20, %cst_24 {dimension_numbers = #tpu.dot_dimension_numbers<[1], [0], [0], [1], [0, 0, 1, 1], [], []>} : vector<8x32xf32>, vector<32x32xf32>, vector<8x32xf32> -> vector<8x32xf32>
    %cst_25 = arith.constant dense<0.000000e+00> : vector<8x32xf32>
    %29 = tpu.matmul %23, %21, %cst_25 {dimension_numbers = #tpu.dot_dimension_numbers<[1], [0], [0], [1], [0, 0, 1, 1], [], []>} : vector<8x32xf32>, vector<32x32xf32>, vector<8x32xf32> -> vector<8x32xf32>
    %cst_26 = arith.constant dense<0.000000e+00> : vector<8x32xf32>
    %30 = tpu.matmul %23, %22, %cst_26 {dimension_numbers = #tpu.dot_dimension_numbers<[1], [0], [0], [1], [0, 0, 1, 1], [], []>} : vector<8x32xf32>, vector<32x32xf32>, vector<8x32xf32> -> vector<8x32xf32>
    %31 = arith.index_cast %26 : i32 to index
    %c0_27 = arith.constant 0 : index
    %32 = vector.load %arg11[%31, %c0_27] : memref<64x32xf32, #tpu.memory_space<vmem>>, vector<8x32xf32>
    %33 = arith.addf %32, %27 : vector<8x32xf32>
    %34 = arith.negf %33 : vector<8x32xf32>
    %35 = math.exp %34 : vector<8x32xf32>
    %cst_28 = arith.constant 1.000000e+00 : f32
    %36 = vector.broadcast %cst_28 : f32 to vector<8x32xf32>
    %37 = arith.addf %36, %35 : vector<8x32xf32>
    %38 = arith.divf %36, %37 : vector<8x32xf32>
    %39 = arith.index_cast %26 : i32 to index
    %c0_29 = arith.constant 0 : index
    %40 = vector.load %arg12[%39, %c0_29] : memref<64x32xf32, #tpu.memory_space<vmem>>, vector<8x32xf32>
    %41 = arith.addf %40, %28 : vector<8x32xf32>
    %42 = arith.negf %41 : vector<8x32xf32>
    %43 = math.exp %42 : vector<8x32xf32>
    %cst_30 = arith.constant 1.000000e+00 : f32
    %44 = vector.broadcast %cst_30 : f32 to vector<8x32xf32>
    %45 = arith.addf %44, %43 : vector<8x32xf32>
    %46 = arith.divf %44, %45 : vector<8x32xf32>
    %47 = arith.index_cast %26 : i32 to index
    %c0_31 = arith.constant 0 : index
    %48 = vector.load %arg13[%47, %c0_31] : memref<64x32xf32, #tpu.memory_space<vmem>>, vector<8x32xf32>
    %49 = arith.addf %48, %29 : vector<8x32xf32>
    %50 = math.tanh %49 : vector<8x32xf32>
    %51 = arith.index_cast %26 : i32 to index
    %c0_32 = arith.constant 0 : index
    %52 = vector.load %arg14[%51, %c0_32] : memref<64x32xf32, #tpu.memory_space<vmem>>, vector<8x32xf32>
    %53 = arith.addf %52, %30 : vector<8x32xf32>
    %54 = arith.negf %53 : vector<8x32xf32>
    %55 = math.exp %54 : vector<8x32xf32>
    %cst_33 = arith.constant 1.000000e+00 : f32
    %56 = vector.broadcast %cst_33 : f32 to vector<8x32xf32>
    %57 = arith.addf %56, %55 : vector<8x32xf32>
    %58 = arith.divf %56, %57 : vector<8x32xf32>
    %59 = arith.mulf %46, %24 : vector<8x32xf32>
    %60 = arith.mulf %38, %50 : vector<8x32xf32>
    %61 = arith.addf %59, %60 : vector<8x32xf32>
    %62 = math.tanh %61 : vector<8x32xf32>
    %63 = arith.mulf %58, %62 : vector<8x32xf32>
    %64 = arith.index_cast %26 : i32 to index
    %c0_34 = arith.constant 0 : index
    %65 = vector.load %arg8[%64, %c0_34] : memref<64x32xf32, #tpu.memory_space<vmem>>, vector<8x32xf32>
    tpu.vector_store %arg8[%64, %c0_34], %63 {strides = array<i32>} : memref<64x32xf32, #tpu.memory_space<vmem>>, vector<8x32xf32>,
    %c1_i32 = arith.constant 1 : i32
    %c8_i32_35 = arith.constant 8 : i32
    %66 = arith.muli %c1_i32, %c8_i32_35 : i32
    %67 = tpu.assume_multiple %66, 8 : i32
    %cst_36 = arith.constant dense<0.000000e+00> : vector<8x32xf32>
    %68 = tpu.matmul %63, %19, %cst_36 {dimension_numbers = #tpu.dot_dimension_numbers<[1], [0], [0], [1], [0, 0, 1, 1], [], []>} : vector<8x32xf32>, vector<32x32xf32>, vector<8x32xf32> -> vector<8x32xf32>
    %cst_37 = arith.constant dense<0.000000e+00> : vector<8x32xf32>
    %69 = tpu.matmul %63, %20, %cst_37 {dimension_numbers = #tpu.dot_dimension_numbers<[1], [0], [0], [1], [0, 0, 1, 1], [], []>} : vector<8x32xf32>, vector<32x32xf32>, vector<8x32xf32> -> vector<8x32xf32>
    %cst_38 = arith.constant dense<0.000000e+00> : vector<8x32xf32>
    %70 = tpu.matmul %63, %21, %cst_38 {dimension_numbers = #tpu.dot_dimension_numbers<[1], [0], [0], [1], [0, 0, 1, 1], [], []>} : vector<8x32xf32>, vector<32x32xf32>, vector<8x32xf32> -> vector<8x32xf32>
    %cst_39 = arith.constant dense<0.000000e+00> : vector<8x32xf32>
    %71 = tpu.matmul %63, %22, %cst_39 {dimension_numbers = #tpu.dot_dimension_numbers<[1], [0], [0], [1], [0, 0, 1, 1], [], []>} : vector<8x32xf32>, vector<32x32xf32>, vector<8x32xf32> -> vector<8x32xf32>
    %72 = arith.index_cast %67 : i32 to index
    %c0_40 = arith.constant 0 : index
    %73 = vector.load %arg11[%72, %c0_40] : memref<64x32xf32, #tpu.memory_space<vmem>>, vector<8x32xf32>
    %74 = arith.addf %73, %68 : vector<8x32xf32>
    %75 = arith.negf %74 : vector<8x32xf32>
    %76 = math.exp %75 : vector<8x32xf32>
    %cst_41 = arith.constant 1.000000e+00 : f32
    %77 = vector.broadcast %cst_41 : f32 to vector<8x32xf32>
    %78 = arith.addf %77, %76 : vector<8x32xf32>
    %79 = arith.divf %77, %78 : vector<8x32xf32>
    %80 = arith.index_cast %67 : i32 to index
    %c0_42 = arith.constant 0 : index
    %81 = vector.load %arg12[%80, %c0_42] : memref<64x32xf32, #tpu.memory_space<vmem>>, vector<8x32xf32>
    %82 = arith.addf %81, %69 : vector<8x32xf32>
    %83 = arith.negf %82 : vector<8x32xf32>
    %84 = math.exp %83 : vector<8x32xf32>
    %cst_43 = arith.constant 1.000000e+00 : f32
    %85 = vector.broadcast %cst_43 : f32 to vector<8x32xf32>
    %86 = arith.addf %85, %84 : vector<8x32xf32>
    %87 = arith.divf %85, %86 : vector<8x32xf32>
    %88 = arith.index_cast %67 : i32 to index
    %c0_44 = arith.constant 0 : index
    %89 = vector.load %arg13[%88, %c0_44] : memref<64x32xf32, #tpu.memory_space<vmem>>, vector<8x32xf32>
    %90 = arith.addf %89, %70 : vector<8x32xf32>
    %91 = math.tanh %90 : vector<8x32xf32>
    %92 = arith.index_cast %67 : i32 to index
    %c0_45 = arith.constant 0 : index
    %93 = vector.load %arg14[%92, %c0_45] : memref<64x32xf32, #tpu.memory_space<vmem>>, vector<8x32xf32>
    %94 = arith.addf %93, %71 : vector<8x32xf32>
    %95 = arith.negf %94 : vector<8x32xf32>
    %96 = math.exp %95 : vector<8x32xf32>
    %cst_46 = arith.constant 1.000000e+00 : f32
    %97 = vector.broadcast %cst_46 : f32 to vector<8x32xf32>
    %98 = arith.addf %97, %96 : vector<8x32xf32>
    %99 = arith.divf %97, %98 : vector<8x32xf32>
    %100 = arith.mulf %87, %61 : vector<8x32xf32>
    %101 = arith.mulf %79, %91 : vector<8x32xf32>
    %102 = arith.addf %100, %101 : vector<8x32xf32>
    %103 = math.tanh %102 : vector<8x32xf32>
    %104 = arith.mulf %99, %103 : vector<8x32xf32>
    %105 = arith.index_cast %67 : i32 to index
    %c0_47 = arith.constant 0 : index
    %106 = vector.load %arg8[%105, %c0_47] : memref<64x32xf32, #tpu.memory_space<vmem>>, vector<8x32xf32>
    tpu.vector_store %arg8[%105, %c0_47], %104 {strides = array<i32>} : memref<64x32xf32, #tpu.memory_space<vmem>>, vector<8x32xf32>,
    %c2_i32 = arith.constant 2 : i32
    %c8_i32_48 = arith.constant 8 : i32
    %107 = arith.muli %c2_i32, %c8_i32_48 : i32
    %108 = tpu.assume_multiple %107, 8 : i32
    %cst_49 = arith.constant dense<0.000000e+00> : vector<8x32xf32>
    %109 = tpu.matmul %104, %19, %cst_49 {dimension_numbers = #tpu.dot_dimension_numbers<[1], [0], [0], [1], [0, 0, 1, 1], [], []>} : vector<8x32xf32>, vector<32x32xf32>, vector<8x32xf32> -> vector<8x32xf32>
    %cst_50 = arith.constant dense<0.000000e+00> : vector<8x32xf32>
    %110 = tpu.matmul %104, %20, %cst_50 {dimension_numbers = #tpu.dot_dimension_numbers<[1], [0], [0], [1], [0, 0, 1, 1], [], []>} : vector<8x32xf32>, vector<32x32xf32>, vector<8x32xf32> -> vector<8x32xf32>
    %cst_51 = arith.constant dense<0.000000e+00> : vector<8x32xf32>
    %111 = tpu.matmul %104, %21, %cst_51 {dimension_numbers = #tpu.dot_dimension_numbers<[1], [0], [0], [1], [0, 0, 1, 1], [], []>} : vector<8x32xf32>, vector<32x32xf32>, vector<8x32xf32> -> vector<8x32xf32>
    %cst_52 = arith.constant dense<0.000000e+00> : vector<8x32xf32>
    %112 = tpu.matmul %104, %22, %cst_52 {dimension_numbers = #tpu.dot_dimension_numbers<[1], [0], [0], [1], [0, 0, 1, 1], [], []>} : vector<8x32xf32>, vector<32x32xf32>, vector<8x32xf32> -> vector<8x32xf32>
    %113 = arith.index_cast %108 : i32 to index
    %c0_53 = arith.constant 0 : index
    %114 = vector.load %arg11[%113, %c0_53] : memref<64x32xf32, #tpu.memory_space<vmem>>, vector<8x32xf32>
    %115 = arith.addf %114, %109 : vector<8x32xf32>
    %116 = arith.negf %115 : vector<8x32xf32>
    %117 = math.exp %116 : vector<8x32xf32>
    %cst_54 = arith.constant 1.000000e+00 : f32
    %118 = vector.broadcast %cst_54 : f32 to vector<8x32xf32>
    %119 = arith.addf %118, %117 : vector<8x32xf32>
    %120 = arith.divf %118, %119 : vector<8x32xf32>
    %121 = arith.index_cast %108 : i32 to index
    %c0_55 = arith.constant 0 : index
    %122 = vector.load %arg12[%121, %c0_55] : memref<64x32xf32, #tpu.memory_space<vmem>>, vector<8x32xf32>
    %123 = arith.addf %122, %110 : vector<8x32xf32>
    %124 = arith.negf %123 : vector<8x32xf32>
    %125 = math.exp %124 : vector<8x32xf32>
    %cst_56 = arith.constant 1.000000e+00 : f32
    %126 = vector.broadcast %cst_56 : f32 to vector<8x32xf32>
    %127 = arith.addf %126, %125 : vector<8x32xf32>
    %128 = arith.divf %126, %127 : vector<8x32xf32>
    %129 = arith.index_cast %108 : i32 to index
    %c0_57 = arith.constant 0 : index
    %130 = vector.load %arg13[%129, %c0_57] : memref<64x32xf32, #tpu.memory_space<vmem>>, vector<8x32xf32>
    %131 = arith.addf %130, %111 : vector<8x32xf32>
    %132 = math.tanh %131 : vector<8x32xf32>
    %133 = arith.index_cast %108 : i32 to index
    %c0_58 = arith.constant 0 : index
    %134 = vector.load %arg14[%133, %c0_58] : memref<64x32xf32, #tpu.memory_space<vmem>>, vector<8x32xf32>
    %135 = arith.addf %134, %112 : vector<8x32xf32>
    %136 = arith.negf %135 : vector<8x32xf32>
    %137 = math.exp %136 : vector<8x32xf32>
    %cst_59 = arith.constant 1.000000e+00 : f32
    %138 = vector.broadcast %cst_59 : f32 to vector<8x32xf32>
    %139 = arith.addf %138, %137 : vector<8x32xf32>
    %140 = arith.divf %138, %139 : vector<8x32xf32>
    %141 = arith.mulf %128, %102 : vector<8x32xf32>
    %142 = arith.mulf %120, %132 : vector<8x32xf32>
    %143 = arith.addf %141, %142 : vector<8x32xf32>
    %144 = math.tanh %143 : vector<8x32xf32>
    %145 = arith.mulf %140, %144 : vector<8x32xf32>
    %146 = arith.index_cast %108 : i32 to index
    %c0_60 = arith.constant 0 : index
    %147 = vector.load %arg8[%146, %c0_60] : memref<64x32xf32, #tpu.memory_space<vmem>>, vector<8x32xf32>
    tpu.vector_store %arg8[%146, %c0_60], %145 {strides = array<i32>} : memref<64x32xf32, #tpu.memory_space<vmem>>, vector<8x32xf32>,
    %c3_i32 = arith.constant 3 : i32
    %c8_i32_61 = arith.constant 8 : i32
    %148 = arith.muli %c3_i32, %c8_i32_61 : i32
    %149 = tpu.assume_multiple %148, 8 : i32
    %cst_62 = arith.constant dense<0.000000e+00> : vector<8x32xf32>
    %150 = tpu.matmul %145, %19, %cst_62 {dimension_numbers = #tpu.dot_dimension_numbers<[1], [0], [0], [1], [0, 0, 1, 1], [], []>} : vector<8x32xf32>, vector<32x32xf32>, vector<8x32xf32> -> vector<8x32xf32>
    %cst_63 = arith.constant dense<0.000000e+00> : vector<8x32xf32>
    %151 = tpu.matmul %145, %20, %cst_63 {dimension_numbers = #tpu.dot_dimension_numbers<[1], [0], [0], [1], [0, 0, 1, 1], [], []>} : vector<8x32xf32>, vector<32x32xf32>, vector<8x32xf32> -> vector<8x32xf32>
    %cst_64 = arith.constant dense<0.000000e+00> : vector<8x32xf32>
    %152 = tpu.matmul %145, %21, %cst_64 {dimension_numbers = #tpu.dot_dimension_numbers<[1], [0], [0], [1], [0, 0, 1, 1], [], []>} : vector<8x32xf32>, vector<32x32xf32>, vector<8x32xf32> -> vector<8x32xf32>
    %cst_65 = arith.constant dense<0.000000e+00> : vector<8x32xf32>
    %153 = tpu.matmul %145, %22, %cst_65 {dimension_numbers = #tpu.dot_dimension_numbers<[1], [0], [0], [1], [0, 0, 1, 1], [], []>} : vector<8x32xf32>, vector<32x32xf32>, vector<8x32xf32> -> vector<8x32xf32>
    %154 = arith.index_cast %149 : i32 to index
    %c0_66 = arith.constant 0 : index
    %155 = vector.load %arg11[%154, %c0_66] : memref<64x32xf32, #tpu.memory_space<vmem>>, vector<8x32xf32>
    %156 = arith.addf %155, %150 : vector<8x32xf32>
    %157 = arith.negf %156 : vector<8x32xf32>
    %158 = math.exp %157 : vector<8x32xf32>
    %cst_67 = arith.constant 1.000000e+00 : f32
    %159 = vector.broadcast %cst_67 : f32 to vector<8x32xf32>
    %160 = arith.addf %159, %158 : vector<8x32xf32>
    %161 = arith.divf %159, %160 : vector<8x32xf32>
    %162 = arith.index_cast %149 : i32 to index
    %c0_68 = arith.constant 0 : index
    %163 = vector.load %arg12[%162, %c0_68] : memref<64x32xf32, #tpu.memory_space<vmem>>, vector<8x32xf32>
    %164 = arith.addf %163, %151 : vector<8x32xf32>
    %165 = arith.negf %164 : vector<8x32xf32>
    %166 = math.exp %165 : vector<8x32xf32>
    %cst_69 = arith.constant 1.000000e+00 : f32
    %167 = vector.broadcast %cst_69 : f32 to vector<8x32xf32>
    %168 = arith.addf %167, %166 : vector<8x32xf32>
    %169 = arith.divf %167, %168 : vector<8x32xf32>
    %170 = arith.index_cast %149 : i32 to index
    %c0_70 = arith.constant 0 : index
    %171 = vector.load %arg13[%170, %c0_70] : memref<64x32xf32, #tpu.memory_space<vmem>>, vector<8x32xf32>
    %172 = arith.addf %171, %152 : vector<8x32xf32>
    %173 = math.tanh %172 : vector<8x32xf32>
    %174 = arith.index_cast %149 : i32 to index
    %c0_71 = arith.constant 0 : index
    %175 = vector.load %arg14[%174, %c0_71] : memref<64x32xf32, #tpu.memory_space<vmem>>, vector<8x32xf32>
    %176 = arith.addf %175, %153 : vector<8x32xf32>
    %177 = arith.negf %176 : vector<8x32xf32>
    %178 = math.exp %177 : vector<8x32xf32>
    %cst_72 = arith.constant 1.000000e+00 : f32
    %179 = vector.broadcast %cst_72 : f32 to vector<8x32xf32>
    %180 = arith.addf %179, %178 : vector<8x32xf32>
    %181 = arith.divf %179, %180 : vector<8x32xf32>
    %182 = arith.mulf %169, %143 : vector<8x32xf32>
    %183 = arith.mulf %161, %173 : vector<8x32xf32>
    %184 = arith.addf %182, %183 : vector<8x32xf32>
    %185 = math.tanh %184 : vector<8x32xf32>
    %186 = arith.mulf %181, %185 : vector<8x32xf32>
    %187 = arith.index_cast %149 : i32 to index
    %c0_73 = arith.constant 0 : index
    %188 = vector.load %arg8[%187, %c0_73] : memref<64x32xf32, #tpu.memory_space<vmem>>, vector<8x32xf32>
    tpu.vector_store %arg8[%187, %c0_73], %186 {strides = array<i32>} : memref<64x32xf32, #tpu.memory_space<vmem>>, vector<8x32xf32>,
    %c4_i32 = arith.constant 4 : i32
    %c8_i32_74 = arith.constant 8 : i32
    %189 = arith.muli %c4_i32, %c8_i32_74 : i32
    %190 = tpu.assume_multiple %189, 8 : i32
    %cst_75 = arith.constant dense<0.000000e+00> : vector<8x32xf32>
    %191 = tpu.matmul %186, %19, %cst_75 {dimension_numbers = #tpu.dot_dimension_numbers<[1], [0], [0], [1], [0, 0, 1, 1], [], []>} : vector<8x32xf32>, vector<32x32xf32>, vector<8x32xf32> -> vector<8x32xf32>
    %cst_76 = arith.constant dense<0.000000e+00> : vector<8x32xf32>
    %192 = tpu.matmul %186, %20, %cst_76 {dimension_numbers = #tpu.dot_dimension_numbers<[1], [0], [0], [1], [0, 0, 1, 1], [], []>} : vector<8x32xf32>, vector<32x32xf32>, vector<8x32xf32> -> vector<8x32xf32>
    %cst_77 = arith.constant dense<0.000000e+00> : vector<8x32xf32>
    %193 = tpu.matmul %186, %21, %cst_77 {dimension_numbers = #tpu.dot_dimension_numbers<[1], [0], [0], [1], [0, 0, 1, 1], [], []>} : vector<8x32xf32>, vector<32x32xf32>, vector<8x32xf32> -> vector<8x32xf32>
    %cst_78 = arith.constant dense<0.000000e+00> : vector<8x32xf32>
    %194 = tpu.matmul %186, %22, %cst_78 {dimension_numbers = #tpu.dot_dimension_numbers<[1], [0], [0], [1], [0, 0, 1, 1], [], []>} : vector<8x32xf32>, vector<32x32xf32>, vector<8x32xf32> -> vector<8x32xf32>
    %195 = arith.index_cast %190 : i32 to index
    %c0_79 = arith.constant 0 : index
    %196 = vector.load %arg11[%195, %c0_79] : memref<64x32xf32, #tpu.memory_space<vmem>>, vector<8x32xf32>
    %197 = arith.addf %196, %191 : vector<8x32xf32>
    %198 = arith.negf %197 : vector<8x32xf32>
    %199 = math.exp %198 : vector<8x32xf32>
    %cst_80 = arith.constant 1.000000e+00 : f32
    %200 = vector.broadcast %cst_80 : f32 to vector<8x32xf32>
    %201 = arith.addf %200, %199 : vector<8x32xf32>
    %202 = arith.divf %200, %201 : vector<8x32xf32>
    %203 = arith.index_cast %190 : i32 to index
    %c0_81 = arith.constant 0 : index
    %204 = vector.load %arg12[%203, %c0_81] : memref<64x32xf32, #tpu.memory_space<vmem>>, vector<8x32xf32>
    %205 = arith.addf %204, %192 : vector<8x32xf32>
    %206 = arith.negf %205 : vector<8x32xf32>
    %207 = math.exp %206 : vector<8x32xf32>
    %cst_82 = arith.constant 1.000000e+00 : f32
    %208 = vector.broadcast %cst_82 : f32 to vector<8x32xf32>
    %209 = arith.addf %208, %207 : vector<8x32xf32>
    %210 = arith.divf %208, %209 : vector<8x32xf32>
    %211 = arith.index_cast %190 : i32 to index
    %c0_83 = arith.constant 0 : index
    %212 = vector.load %arg13[%211, %c0_83] : memref<64x32xf32, #tpu.memory_space<vmem>>, vector<8x32xf32>
    %213 = arith.addf %212, %193 : vector<8x32xf32>
    %214 = math.tanh %213 : vector<8x32xf32>
    %215 = arith.index_cast %190 : i32 to index
    %c0_84 = arith.constant 0 : index
    %216 = vector.load %arg14[%215, %c0_84] : memref<64x32xf32, #tpu.memory_space<vmem>>, vector<8x32xf32>
    %217 = arith.addf %216, %194 : vector<8x32xf32>
    %218 = arith.negf %217 : vector<8x32xf32>
    %219 = math.exp %218 : vector<8x32xf32>
    %cst_85 = arith.constant 1.000000e+00 : f32
    %220 = vector.broadcast %cst_85 : f32 to vector<8x32xf32>
    %221 = arith.addf %220, %219 : vector<8x32xf32>
    %222 = arith.divf %220, %221 : vector<8x32xf32>
    %223 = arith.mulf %210, %184 : vector<8x32xf32>
    %224 = arith.mulf %202, %214 : vector<8x32xf32>
    %225 = arith.addf %223, %224 : vector<8x32xf32>
    %226 = math.tanh %225 : vector<8x32xf32>
    %227 = arith.mulf %222, %226 : vector<8x32xf32>
    %228 = arith.index_cast %190 : i32 to index
    %c0_86 = arith.constant 0 : index
    %229 = vector.load %arg8[%228, %c0_86] : memref<64x32xf32, #tpu.memory_space<vmem>>, vector<8x32xf32>
    tpu.vector_store %arg8[%228, %c0_86], %227 {strides = array<i32>} : memref<64x32xf32, #tpu.memory_space<vmem>>, vector<8x32xf32>,
    %c5_i32 = arith.constant 5 : i32
    %c8_i32_87 = arith.constant 8 : i32
    %230 = arith.muli %c5_i32, %c8_i32_87 : i32
    %231 = tpu.assume_multiple %230, 8 : i32
    %cst_88 = arith.constant dense<0.000000e+00> : vector<8x32xf32>
    %232 = tpu.matmul %227, %19, %cst_88 {dimension_numbers = #tpu.dot_dimension_numbers<[1], [0], [0], [1], [0, 0, 1, 1], [], []>} : vector<8x32xf32>, vector<32x32xf32>, vector<8x32xf32> -> vector<8x32xf32>
    %cst_89 = arith.constant dense<0.000000e+00> : vector<8x32xf32>
    %233 = tpu.matmul %227, %20, %cst_89 {dimension_numbers = #tpu.dot_dimension_numbers<[1], [0], [0], [1], [0, 0, 1, 1], [], []>} : vector<8x32xf32>, vector<32x32xf32>, vector<8x32xf32> -> vector<8x32xf32>
    %cst_90 = arith.constant dense<0.000000e+00> : vector<8x32xf32>
    %234 = tpu.matmul %227, %21, %cst_90 {dimension_numbers = #tpu.dot_dimension_numbers<[1], [0], [0], [1], [0, 0, 1, 1], [], []>} : vector<8x32xf32>, vector<32x32xf32>, vector<8x32xf32> -> vector<8x32xf32>
    %cst_91 = arith.constant dense<0.000000e+00> : vector<8x32xf32>
    %235 = tpu.matmul %227, %22, %cst_91 {dimension_numbers = #tpu.dot_dimension_numbers<[1], [0], [0], [1], [0, 0, 1, 1], [], []>} : vector<8x32xf32>, vector<32x32xf32>, vector<8x32xf32> -> vector<8x32xf32>
    %236 = arith.index_cast %231 : i32 to index
    %c0_92 = arith.constant 0 : index
    %237 = vector.load %arg11[%236, %c0_92] : memref<64x32xf32, #tpu.memory_space<vmem>>, vector<8x32xf32>
    %238 = arith.addf %237, %232 : vector<8x32xf32>
    %239 = arith.negf %238 : vector<8x32xf32>
    %240 = math.exp %239 : vector<8x32xf32>
    %cst_93 = arith.constant 1.000000e+00 : f32
    %241 = vector.broadcast %cst_93 : f32 to vector<8x32xf32>
    %242 = arith.addf %241, %240 : vector<8x32xf32>
    %243 = arith.divf %241, %242 : vector<8x32xf32>
    %244 = arith.index_cast %231 : i32 to index
    %c0_94 = arith.constant 0 : index
    %245 = vector.load %arg12[%244, %c0_94] : memref<64x32xf32, #tpu.memory_space<vmem>>, vector<8x32xf32>
    %246 = arith.addf %245, %233 : vector<8x32xf32>
    %247 = arith.negf %246 : vector<8x32xf32>
    %248 = math.exp %247 : vector<8x32xf32>
    %cst_95 = arith.constant 1.000000e+00 : f32
    %249 = vector.broadcast %cst_95 : f32 to vector<8x32xf32>
    %250 = arith.addf %249, %248 : vector<8x32xf32>
    %251 = arith.divf %249, %250 : vector<8x32xf32>
    %252 = arith.index_cast %231 : i32 to index
    %c0_96 = arith.constant 0 : index
    %253 = vector.load %arg13[%252, %c0_96] : memref<64x32xf32, #tpu.memory_space<vmem>>, vector<8x32xf32>
    %254 = arith.addf %253, %234 : vector<8x32xf32>
    %255 = math.tanh %254 : vector<8x32xf32>
    %256 = arith.index_cast %231 : i32 to index
    %c0_97 = arith.constant 0 : index
    %257 = vector.load %arg14[%256, %c0_97] : memref<64x32xf32, #tpu.memory_space<vmem>>, vector<8x32xf32>
    %258 = arith.addf %257, %235 : vector<8x32xf32>
    %259 = arith.negf %258 : vector<8x32xf32>
    %260 = math.exp %259 : vector<8x32xf32>
    %cst_98 = arith.constant 1.000000e+00 : f32
    %261 = vector.broadcast %cst_98 : f32 to vector<8x32xf32>
    %262 = arith.addf %261, %260 : vector<8x32xf32>
    %263 = arith.divf %261, %262 : vector<8x32xf32>
    %264 = arith.mulf %251, %225 : vector<8x32xf32>
    %265 = arith.mulf %243, %255 : vector<8x32xf32>
    %266 = arith.addf %264, %265 : vector<8x32xf32>
    %267 = math.tanh %266 : vector<8x32xf32>
    %268 = arith.mulf %263, %267 : vector<8x32xf32>
    %269 = arith.index_cast %231 : i32 to index
    %c0_99 = arith.constant 0 : index
    %270 = vector.load %arg8[%269, %c0_99] : memref<64x32xf32, #tpu.memory_space<vmem>>, vector<8x32xf32>
    tpu.vector_store %arg8[%269, %c0_99], %268 {strides = array<i32>} : memref<64x32xf32, #tpu.memory_space<vmem>>, vector<8x32xf32>,
    %c6_i32 = arith.constant 6 : i32
    %c8_i32_100 = arith.constant 8 : i32
    %271 = arith.muli %c6_i32, %c8_i32_100 : i32
    %272 = tpu.assume_multiple %271, 8 : i32
    %cst_101 = arith.constant dense<0.000000e+00> : vector<8x32xf32>
    %273 = tpu.matmul %268, %19, %cst_101 {dimension_numbers = #tpu.dot_dimension_numbers<[1], [0], [0], [1], [0, 0, 1, 1], [], []>} : vector<8x32xf32>, vector<32x32xf32>, vector<8x32xf32> -> vector<8x32xf32>
    %cst_102 = arith.constant dense<0.000000e+00> : vector<8x32xf32>
    %274 = tpu.matmul %268, %20, %cst_102 {dimension_numbers = #tpu.dot_dimension_numbers<[1], [0], [0], [1], [0, 0, 1, 1], [], []>} : vector<8x32xf32>, vector<32x32xf32>, vector<8x32xf32> -> vector<8x32xf32>
    %cst_103 = arith.constant dense<0.000000e+00> : vector<8x32xf32>
    %275 = tpu.matmul %268, %21, %cst_103 {dimension_numbers = #tpu.dot_dimension_numbers<[1], [0], [0], [1], [0, 0, 1, 1], [], []>} : vector<8x32xf32>, vector<32x32xf32>, vector<8x32xf32> -> vector<8x32xf32>
    %cst_104 = arith.constant dense<0.000000e+00> : vector<8x32xf32>
    %276 = tpu.matmul %268, %22, %cst_104 {dimension_numbers = #tpu.dot_dimension_numbers<[1], [0], [0], [1], [0, 0, 1, 1], [], []>} : vector<8x32xf32>, vector<32x32xf32>, vector<8x32xf32> -> vector<8x32xf32>
    %277 = arith.index_cast %272 : i32 to index
    %c0_105 = arith.constant 0 : index
    %278 = vector.load %arg11[%277, %c0_105] : memref<64x32xf32, #tpu.memory_space<vmem>>, vector<8x32xf32>
    %279 = arith.addf %278, %273 : vector<8x32xf32>
    %280 = arith.negf %279 : vector<8x32xf32>
    %281 = math.exp %280 : vector<8x32xf32>
    %cst_106 = arith.constant 1.000000e+00 : f32
    %282 = vector.broadcast %cst_106 : f32 to vector<8x32xf32>
    %283 = arith.addf %282, %281 : vector<8x32xf32>
    %284 = arith.divf %282, %283 : vector<8x32xf32>
    %285 = arith.index_cast %272 : i32 to index
    %c0_107 = arith.constant 0 : index
    %286 = vector.load %arg12[%285, %c0_107] : memref<64x32xf32, #tpu.memory_space<vmem>>, vector<8x32xf32>
    %287 = arith.addf %286, %274 : vector<8x32xf32>
    %288 = arith.negf %287 : vector<8x32xf32>
    %289 = math.exp %288 : vector<8x32xf32>
    %cst_108 = arith.constant 1.000000e+00 : f32
    %290 = vector.broadcast %cst_108 : f32 to vector<8x32xf32>
    %291 = arith.addf %290, %289 : vector<8x32xf32>
    %292 = arith.divf %290, %291 : vector<8x32xf32>
    %293 = arith.index_cast %272 : i32 to index
    %c0_109 = arith.constant 0 : index
    %294 = vector.load %arg13[%293, %c0_109] : memref<64x32xf32, #tpu.memory_space<vmem>>, vector<8x32xf32>
    %295 = arith.addf %294, %275 : vector<8x32xf32>
    %296 = math.tanh %295 : vector<8x32xf32>
    %297 = arith.index_cast %272 : i32 to index
    %c0_110 = arith.constant 0 : index
    %298 = vector.load %arg14[%297, %c0_110] : memref<64x32xf32, #tpu.memory_space<vmem>>, vector<8x32xf32>
    %299 = arith.addf %298, %276 : vector<8x32xf32>
    %300 = arith.negf %299 : vector<8x32xf32>
    %301 = math.exp %300 : vector<8x32xf32>
    %cst_111 = arith.constant 1.000000e+00 : f32
    %302 = vector.broadcast %cst_111 : f32 to vector<8x32xf32>
    %303 = arith.addf %302, %301 : vector<8x32xf32>
    %304 = arith.divf %302, %303 : vector<8x32xf32>
    %305 = arith.mulf %292, %266 : vector<8x32xf32>
    %306 = arith.mulf %284, %296 : vector<8x32xf32>
    %307 = arith.addf %305, %306 : vector<8x32xf32>
    %308 = math.tanh %307 : vector<8x32xf32>
    %309 = arith.mulf %304, %308 : vector<8x32xf32>
    %310 = arith.index_cast %272 : i32 to index
    %c0_112 = arith.constant 0 : index
    %311 = vector.load %arg8[%310, %c0_112] : memref<64x32xf32, #tpu.memory_space<vmem>>, vector<8x32xf32>
    tpu.vector_store %arg8[%310, %c0_112], %309 {strides = array<i32>} : memref<64x32xf32, #tpu.memory_space<vmem>>, vector<8x32xf32>,
    %c7_i32 = arith.constant 7 : i32
    %c8_i32_113 = arith.constant 8 : i32
    %312 = arith.muli %c7_i32, %c8_i32_113 : i32
    %313 = tpu.assume_multiple %312, 8 : i32
    %cst_114 = arith.constant dense<0.000000e+00> : vector<8x32xf32>
    %314 = tpu.matmul %309, %19, %cst_114 {dimension_numbers = #tpu.dot_dimension_numbers<[1], [0], [0], [1], [0, 0, 1, 1], [], []>} : vector<8x32xf32>, vector<32x32xf32>, vector<8x32xf32> -> vector<8x32xf32>
    %cst_115 = arith.constant dense<0.000000e+00> : vector<8x32xf32>
    %315 = tpu.matmul %309, %20, %cst_115 {dimension_numbers = #tpu.dot_dimension_numbers<[1], [0], [0], [1], [0, 0, 1, 1], [], []>} : vector<8x32xf32>, vector<32x32xf32>, vector<8x32xf32> -> vector<8x32xf32>
    %cst_116 = arith.constant dense<0.000000e+00> : vector<8x32xf32>
    %316 = tpu.matmul %309, %21, %cst_116 {dimension_numbers = #tpu.dot_dimension_numbers<[1], [0], [0], [1], [0, 0, 1, 1], [], []>} : vector<8x32xf32>, vector<32x32xf32>, vector<8x32xf32> -> vector<8x32xf32>
    %cst_117 = arith.constant dense<0.000000e+00> : vector<8x32xf32>
    %317 = tpu.matmul %309, %22, %cst_117 {dimension_numbers = #tpu.dot_dimension_numbers<[1], [0], [0], [1], [0, 0, 1, 1], [], []>} : vector<8x32xf32>, vector<32x32xf32>, vector<8x32xf32> -> vector<8x32xf32>
    %318 = arith.index_cast %313 : i32 to index
    %c0_118 = arith.constant 0 : index
    %319 = vector.load %arg11[%318, %c0_118] : memref<64x32xf32, #tpu.memory_space<vmem>>, vector<8x32xf32>
    %320 = arith.addf %319, %314 : vector<8x32xf32>
    %321 = arith.negf %320 : vector<8x32xf32>
    %322 = math.exp %321 : vector<8x32xf32>
    %cst_119 = arith.constant 1.000000e+00 : f32
    %323 = vector.broadcast %cst_119 : f32 to vector<8x32xf32>
    %324 = arith.addf %323, %322 : vector<8x32xf32>
    %325 = arith.divf %323, %324 : vector<8x32xf32>
    %326 = arith.index_cast %313 : i32 to index
    %c0_120 = arith.constant 0 : index
    %327 = vector.load %arg12[%326, %c0_120] : memref<64x32xf32, #tpu.memory_space<vmem>>, vector<8x32xf32>
    %328 = arith.addf %327, %315 : vector<8x32xf32>
    %329 = arith.negf %328 : vector<8x32xf32>
    %330 = math.exp %329 : vector<8x32xf32>
    %cst_121 = arith.constant 1.000000e+00 : f32
    %331 = vector.broadcast %cst_121 : f32 to vector<8x32xf32>
    %332 = arith.addf %331, %330 : vector<8x32xf32>
    %333 = arith.divf %331, %332 : vector<8x32xf32>
    %334 = arith.index_cast %313 : i32 to index
    %c0_122 = arith.constant 0 : index
    %335 = vector.load %arg13[%334, %c0_122] : memref<64x32xf32, #tpu.memory_space<vmem>>, vector<8x32xf32>
    %336 = arith.addf %335, %316 : vector<8x32xf32>
    %337 = math.tanh %336 : vector<8x32xf32>
    %338 = arith.index_cast %313 : i32 to index
    %c0_123 = arith.constant 0 : index
    %339 = vector.load %arg14[%338, %c0_123] : memref<64x32xf32, #tpu.memory_space<vmem>>, vector<8x32xf32>
    %340 = arith.addf %339, %317 : vector<8x32xf32>
    %341 = arith.negf %340 : vector<8x32xf32>
    %342 = math.exp %341 : vector<8x32xf32>
    %cst_124 = arith.constant 1.000000e+00 : f32
    %343 = vector.broadcast %cst_124 : f32 to vector<8x32xf32>
    %344 = arith.addf %343, %342 : vector<8x32xf32>
    %345 = arith.divf %343, %344 : vector<8x32xf32>
    %346 = arith.mulf %333, %307 : vector<8x32xf32>
    %347 = arith.mulf %325, %337 : vector<8x32xf32>
    %348 = arith.addf %346, %347 : vector<8x32xf32>
    %349 = math.tanh %348 : vector<8x32xf32>
    %350 = arith.mulf %345, %349 : vector<8x32xf32>
    %351 = arith.index_cast %313 : i32 to index
    %c0_125 = arith.constant 0 : index
    %352 = vector.load %arg8[%351, %c0_125] : memref<64x32xf32, #tpu.memory_space<vmem>>, vector<8x32xf32>
    tpu.vector_store %arg8[%351, %c0_125], %350 {strides = array<i32>} : memref<64x32xf32, #tpu.memory_space<vmem>>, vector<8x32xf32>,
    %c8_i32_126 = arith.constant 8 : i32
    %c0_127 = arith.constant 0 : index
    %c0_128 = arith.constant 0 : index
    %353 = vector.load %arg9[%c0_127, %c0_128] : memref<8x32xf32, #tpu.memory_space<vmem>>, vector<8x32xf32>
    tpu.vector_store %arg9[%c0_127, %c0_128], %350 {strides = array<i32>} : memref<8x32xf32, #tpu.memory_space<vmem>>, vector<8x32xf32>,
    %c0_129 = arith.constant 0 : index
    %c0_130 = arith.constant 0 : index
    %354 = vector.load %arg10[%c0_129, %c0_130] : memref<8x32xf32, #tpu.memory_space<vmem>>, vector<8x32xf32>
    tpu.vector_store %arg10[%c0_129, %c0_130], %348 {strides = array<i32>} : memref<8x32xf32, #tpu.memory_space<vmem>>, vector<8x32xf32>,
    return
  }
  func.func @transform_0(%arg0: i32) -> (i32, i32) {
    %c0_i32 = arith.constant 0 : i32
    %c0_i32_0 = arith.constant 0 : i32
    %c0_i32_1 = arith.constant 0 : i32
    return %c0_i32, %c0_i32_0 : i32, i32
  }
  func.func @transform_1(%arg0: i32) -> (i32, i32) {
    %c0_i32 = arith.constant 0 : i32
    %c0_i32_0 = arith.constant 0 : i32
    %c0_i32_1 = arith.constant 0 : i32
    return %c0_i32, %c0_i32_0 : i32, i32
  }
  func.func @transform_2(%arg0: i32) -> (i32, i32) {
    %c0_i32 = arith.constant 0 : i32
    %c0_i32_0 = arith.constant 0 : i32
    %c0_i32_1 = arith.constant 0 : i32
    return %c0_i32, %c0_i32_0 : i32, i32
  }
  func.func @transform_3(%arg0: i32) -> (i32, i32) {
    %c0_i32 = arith.constant 0 : i32
    %c0_i32_0 = arith.constant 0 : i32
    %c0_i32_1 = arith.constant 0 : i32
    return %c0_i32, %c0_i32_0 : i32, i32
  }
  func.func @transform_4(%arg0: i32) -> (i32, i32) {
    %c0_i32 = arith.constant 0 : i32
    %c0_i32_0 = arith.constant 0 : i32
    %c0_i32_1 = arith.constant 0 : i32
    return %c0_i32, %c0_i32_0 : i32, i32
  }
  func.func @transform_5(%arg0: i32) -> (i32, i32) {
    %c0_i32 = arith.constant 0 : i32
    %c0_i32_0 = arith.constant 0 : i32
    %c0_i32_1 = arith.constant 0 : i32
    return %c0_i32, %c0_i32_0 : i32, i32
  }
  func.func @transform_6(%arg0: i32) -> (i32, i32) {
    %c0_i32 = arith.constant 0 : i32
    %c0_i32_0 = arith.constant 0 : i32
    %c0_i32_1 = arith.constant 0 : i32
    return %c0_i32, %c0_i32_0 : i32, i32
  }
  func.func @transform_7(%arg0: i32) -> (i32, i32) {
    %c0_i32 = arith.constant 0 : i32
    %c0_i32_0 = arith.constant 0 : i32
    %c0_i32_1 = arith.constant 0 : i32
    return %c0_i32, %c0_i32_0 : i32, i32
  }
  func.func @transform_8(%arg0: i32) -> (i32, i32) {
    %c0_i32 = arith.constant 0 : i32
    %c0_i32_0 = arith.constant 0 : i32
    %c0_i32_1 = arith.constant 0 : i32
    return %c0_i32, %c0_i32_0 : i32, i32
  }
  func.func @transform_9(%arg0: i32) -> (i32, i32) {
    %c0_i32 = arith.constant 0 : i32
    %c0_i32_0 = arith.constant 0 : i32
    %c0_i32_1 = arith.constant 0 : i32
    return %c0_i32, %c0_i32_0 : i32, i32
  }
}

</mosaic_0001>

<bundles_post_ra>
// kernel: agreement_model_forward.1
= control target key start
LH: loop header
LB: loop body
LE: loop exit
PB: predicated region body
PF: predicated region fallthrough
CT: control target
= control target key end

     0   :  { %v3939_v0 = vmov 0   ;;  %v3940_v14 = vmov 0.0|0.0   ;;  %vm3941_vm0 = vmmov 0   ;;  %v3942_v20 = vmov 0.0   ;;  %s3944_s10 = smov 32   ;;  %s3945_s11 = smov 96   ;;  %s4508_s0 = inlined_call_operand.vmem [shape: s32[64,1], index: 0, kind: input, shape index: {}]   ;;  %s4509_s1 = inlined_call_operand.vmem [shape: f32[128,128], index: 1, kind: input, shape index: {}]   ;;  %s4510_s3 = inlined_call_operand.vmem [shape: f32[32,32], index: 3, kind: input, shape index: {}]   ;;  %s4511_s4 = inlined_call_operand.vmem [shape: f32[32,32], index: 4, kind: input, shape index: {}]   ;;  %s4512_s5 = inlined_call_operand.vmem [shape: f32[32,32], index: 5, kind: input, shape index: {}]   ;;  %s4513_s6 = inlined_call_operand.vmem [shape: f32[32,32], index: 6, kind: input, shape index: {}]   ;;  %s4514_s2 = inlined_call_operand.vmem [shape: f32[1,128], index: 2, kind: input, shape index: {}]   ;;  %s4515_s7 = inlined_call_operand.vmem [shape: f32[64,32], index: 7, kind: output, shape index: {0}]   ;;  %s4516_s9 = inlined_call_operand.vmem [shape: f32[8,32], index: 9, kind: output, shape index: {2}]   ;;  %s4517_s8 = inlined_call_operand.vmem [shape: f32[8,32], index: 8, kind: output, shape index: {1}]  }
   0x1   :  { %3809 = vset.pattern.permute.xlu0 %v3939_v0  ;;  %v29_v1 = vld [vmem:[%s4508_s0] sm:$0xff]  ;;  %3810 = vset.pattern.permute.xlu1 %v3939_v0  ;;  %v88_v3 = vld [vmem:[%s4509_s1 + $0x8] sm:$0xff]  ;;  %v89_v4 = vld [vmem:[%s4509_s1 + $0x10] sm:$0xff]  ;;  %v37_v53 = vlaneseq  ;;  %v3943_v56 = vmov 1.0   ;;  %vm215_vm3 = vcmask 261120   ;;  %s3946_s13 = smov 64  }
   0x2   :  { %v87_v2 = vld [vmem:[%s4509_s1] sm:$0xff]  ;;  %40 = vperm.xlu0 %3809, %v29_v1   ;;  %v90_v5 = vld [vmem:[%s4509_s1 + $0x18] sm:$0xff]  ;;  %v30_v6 = vld [vmem:[%s4508_s0 + $0x8] sm:$0xff]  ;;  %3609 = vmatprep.subr.bf16.mxu1 %v3940_v14 }
   0x3   :  { %v3577_v7 = vpack.c.bf16 %v88_v3, %v87_v2  ;;  %v3581_v8 = vpack.c.bf16 %v90_v5, %v89_v4  ;;  %v91_v9 = vld [vmem:[%s4509_s1 + $0x20] sm:$0xff]  ;;  %v92_v10 = vld [vmem:[%s4509_s1 + $0x28] sm:$0xff]  ;;  %v93_v12 = vld [vmem:[%s4509_s1 + $0x30] sm:$0xff]  ;;  %3233 = vmatprep.mubr.msk.f32.mxu1 %vm3941_vm0, %v3942_v20  ;;  %v4151_v54 = vand.u32 127, %v37_v53 }
   0x4   :  { %v3585_v11 = vpack.c.bf16 %v92_v10, %v91_v9  ;;  %v94_v13 = vld [vmem:[%s4509_s1 + $0x38] sm:$0xff]  ;;  %v328_v15 = vld [vmem:[%s4510_s3] sm:$0xff]  ;;  %v329_v16 = vld [vmem:[%s4510_s3 + $0x8] sm:$0xff] }
   0x5   :  { %3578 = vmatprep.subr.bf16.mxu0 %v3577_v7  ;;  %v330_v17 = vld [vmem:[%s4510_s3 + $0x10] sm:$0xff]  ;;  %v4037_v18 = vpack.c.bf16 %v329_v16, %v328_v15  ;;  %v331_v19 = vld [vmem:[%s4510_s3 + $0x18] sm:$0xff]  ;;  %v3589_v21 = vpack.c.bf16 %v94_v13, %v93_v12  ;;  %v95_v22 = vld [vmem:[%s4509_s1 + $0x40] sm:$0xff] }
   0x6   :  { %43 = vperm.xlu0 %3809, %v30_v6   ;;  %3580 = vmatpush3.bf16.msra.mxu0 %v3577_v7  ;;  %v4048_v23 = vpack.c.bf16 %v331_v19, %v330_v17  ;;  %v96_v24 = vld [vmem:[%s4509_s1 + $0x48] sm:$0xff]  ;;  %v332_v25 = vld [vmem:[%s4511_s4] sm:$0xff]  ;;  %v97_v28 = vld [vmem:[%s4509_s1 + $0x50] sm:$0xff] }
   0x7   :  { %3582 = vmatprep.subr.bf16.mxu0 %v3581_v8  ;;  %3611 = vmatpush3.bf16.msra.mxu1 %v4037_v18  ;;  %v333_v26 = vld [vmem:[%s4511_s4 + $0x8] sm:$0xff]  ;;  %v3593_v27 = vpack.c.bf16 %v96_v24, %v95_v22  ;;  %v98_v30 = vld [vmem:[%s4509_s1 + $0x58] sm:$0xff]  ;;  %v334_v31 = vld [vmem:[%s4511_s4 + $0x10] sm:$0xff] }
   0x8   :  { %3612 = vmatprep.subr.bf16.mxu1 %v3940_v14  ;;  %v4064_v29 = vpack.c.bf16 %v333_v26, %v332_v25  ;;  %v335_v32 = vld [vmem:[%s4511_s4 + $0x18] sm:$0xff]  ;;  %v3597_v33 = vpack.c.bf16 %v98_v30, %v97_v28  ;;  %v99_v34 = vld [vmem:[%s4509_s1 + $0x60] sm:$0xff]  ;;  %v100_v36 = vld [vmem:[%s4509_s1 + $0x68] sm:$0xff] }
   0x9   :  { %v4081_v35 = vpack.c.bf16 %v335_v32, %v334_v31  ;;  %v336_v37 = vld [vmem:[%s4512_s5] sm:$0xff]  ;;  %v337_v38 = vld [vmem:[%s4512_s5 + $0x8] sm:$0xff]  ;;  %v3601_v39 = vpack.c.bf16 %v100_v36, %v99_v34  ;;  %v101_v40 = vld [vmem:[%s4509_s1 + $0x70] sm:$0xff] }
   0xa   :  { %3584 = vmatpush3.bf16.msra.mxu0 %v3581_v8  ;;  %v4099_v41 = vpack.c.bf16 %v337_v38, %v336_v37  ;;  %v102_v42 = vld [vmem:[%s4509_s1 + $0x78] sm:$0xff]  ;;  %v338_v43 = vld [vmem:[%s4512_s5 + $0x10] sm:$0xff]  ;;  %v340_v47 = vld [vmem:[%s4513_s6] sm:$0xff] }
   0xb   :  { %3586 = vmatprep.subr.bf16.mxu0 %v3585_v11  ;;  %3614 = vmatpush3.bf16.msra.mxu1 %v4048_v23  ;;  %v339_v44 = vld [vmem:[%s4512_s5 + $0x18] sm:$0xff]  ;;  %v3605_v45 = vpack.c.bf16 %v102_v42, %v101_v40  ;;  %v341_v48 = vld [vmem:[%s4513_s6 + $0x8] sm:$0xff]  ;;  %v342_v50 = vld [vmem:[%s4513_s6 + $0x10] sm:$0xff] }
   0xc   :  { %3615 = vmatprep.subr.bf16.mxu1 %v3940_v14  ;;  %v4113_v46 = vpack.c.bf16 %v339_v44, %v338_v43  ;;  %v4125_v49 = vpack.c.bf16 %v341_v48, %v340_v47  ;;  %v343_v51 = vld [vmem:[%s4513_s6 + $0x18] sm:$0xff]  ;;  %v4164_v0 = vld [vmem:[%s4514_s2] ss:$0 sm:$0xff]  ;;  %v34_v8 = vld [vmem:[%s4508_s0 + $0x28] sm:$0xff] }
   0xd   :  { %v4136_v52 = vpack.c.bf16 %v343_v51, %v342_v50  ;;  %v32_v7 = vld [vmem:[%s4508_s0 + $0x18] sm:$0xff]  ;;  %v31_v9 = vld [vmem:[%s4508_s0 + $0x10] sm:$0xff] }
   0xe   :  { %3588 = vmatpush3.bf16.msra.mxu0 %v3585_v11  ;;  %3234 = vmatmul.mubr.f32.vlgmr.msra.gmra.mrb[0].mxu1 %v3942_v20  ;;  %v36_v10 = vld [vmem:[%s4508_s0 + $0x38] sm:$0xff]  ;;  %v33_v11 = vld [vmem:[%s4508_s0 + $0x20] sm:$0xff]  ;;  %v35_v12 = vld [vmem:[%s4508_s0 + $0x30] sm:$0xff] }
   0xf   :  { %3590 = vmatprep.subr.bf16.mxu0 %v3589_v21  ;;  %3617 = vmatpush3.bf16.msra.mxu1 %v4064_v29 }
  0x10   :  { %3618 = vmatprep.subr.bf16.mxu1 %v3940_v14  ;;  %3244 = vmatprep.mubr.msk.f32.mxu1 %vm3941_vm0, %v3942_v20 }
  0x12   :  { %3592 = vmatpush3.bf16.msra.mxu0 %v3589_v21 }
  0x13   :  { %3594 = vmatprep.subr.bf16.mxu0 %v3593_v27  ;;  %3620 = vmatpush3.bf16.msra.mxu1 %v4081_v35 }
  0x14   :  { %3621 = vmatprep.subr.bf16.mxu1 %v3940_v14 }
  0x16   :  { %3596 = vmatpush3.bf16.msra.mxu0 %v3593_v27  ;;  %3245 = vmatmul.mubr.f32.vlgmr.msra.gmra.mrb[2].mxu1 %v3942_v20 }
  0x17   :  { %3598 = vmatprep.subr.bf16.mxu0 %v3597_v33  ;;  %3623 = vmatpush3.bf16.msra.mxu1 %v4099_v41 }
  0x18   :  { %3624 = vmatprep.subr.bf16.mxu1 %v3940_v14  ;;  %3255 = vmatprep.mubr.msk.f32.mxu1 %vm3941_vm0, %v3942_v20 }
  0x1a   :  { %3600 = vmatpush3.bf16.msra.mxu0 %v3597_v33 }
  0x1b   :  { %3602 = vmatprep.subr.bf16.mxu0 %v3601_v39  ;;  %3626 = vmatpush3.bf16.msra.mxu1 %v4113_v46 }
  0x1c   :  { %3627 = vmatprep.subr.bf16.mxu1 %v3940_v14 }
  0x1e   :  { %3604 = vmatpush3.bf16.msra.mxu0 %v3601_v39  ;;  %3256 = vmatmul.mubr.f32.vlgmr.msra.gmra.mrb[4].mxu1 %v3942_v20 }
  0x1f   :  { %3606 = vmatprep.subr.bf16.mxu0 %v3605_v45  ;;  %3629 = vmatpush3.bf16.msra.mxu1 %v4125_v49 }
  0x20   :  { %3266 = vmatprep.mubr.msk.f32.mxu1 %vm3941_vm0, %v3942_v20  ;;  %3630 = vmatprep.subr.bf16.mxu1 %v3940_v14 }
  0x22   :  { %3608 = vmatpush3.bf16.msra.mxu0 %v3605_v45 }
  0x23   :  { %3639 = vmatprep.subr.bf16.mxu0 %v3940_v14  ;;  %3632 = vmatpush3.bf16.msra.mxu1 %v4136_v52 }
  0x24   :  { %3633 = vmatprep.subr.bf16.mxu1 %v3940_v14 }
  0x26   :  { %3267 = vmatmul.mubr.f32.vlgmr.msra.gmra.mrb[6].mxu1 %v3942_v20 }
  0x27   :  { %3635 = vmatpush3.bf16.msra.mxu1 %v4037_v18  ;;  %3277 = vmatprep.mubr.msk.f32.mxu1 %vm3941_vm0, %v3942_v20 }
  0x28   :  { %3636 = vmatprep.subr.bf16.mxu1 %v3940_v14 }
  0x2b   :  { %3638 = vmatpush3.bf16.msra.mxu1 %v4048_v23 }
  0x2c   :  { %3645 = vmatprep.subr.bf16.mxu1 %v3940_v14 }
  0x81   :  { %v41_v55 = vpop.permute.xlu0 %40 }
  0x82   :  { %vm63_vm1 = vcmp.eq.s32.totalorder %v41_v55, %v4151_v54 }
  0x83   :  { %3213 = vmatprep.mubr.msk.f32.mxu0 %vm63_vm1, %v3943_v56 }
  0x85   :  { %v44_v57 = vpop.permute.xlu0 %43 }
  0x86   :  { %vm64_vm2 = vcmp.eq.s32.totalorder %v44_v57, %v4151_v54 }
  0x87   :  { %3214 = vmatmul.mubr.msk.f32.vlgmr.msra.gmra.mrb[0].mxu0 %vm64_vm2, %v3943_v56 }
  0x88   :  { %3641 = vmatpush3.bf16.msra.mxu0 %v4064_v29 }
  0x89   :  { %3642 = vmatprep.subr.bf16.mxu0 %v3940_v14 }
  0x8c   :  { %3644 = vmatpush3.bf16.msra.mxu0 %v4081_v35 }
  0x8d   :  { %3651 = vmatprep.subr.bf16.mxu0 %v3940_v14 }
  0xe1   :  { %v413_v58 = vpop.f32.mrb[0].mxu1 }
  0xe2   :  { %v3235_v59 = vpop.f32.mrb[1].mxu1 }
  0xe9   :  { %v483_v60 = vpop.f32.mrb[2].mxu1 }
  0xea   :  { %v3246_v61 = vpop.f32.mrb[3].mxu1 }
  0xf1   :  { %v553_v62 = vpop.f32.mrb[4].mxu1 }
  0xf2   :  { %v3257_v63 = vpop.f32.mrb[5].mxu1 }
  0xf9   :  { %v623_v1 = vpop.f32.mrb[6].mxu1 }
  0xfa   :  { %v3268_v2 = vpop.f32.mrb[7].mxu1 }
 0x15a   :  { %v3215_v3 = vpop.f32.mrb[0].mxu0 }
 0x15b   :  { %v182_v4 = vadd.f32 %v3215_v3, %v4164_v0  ;;  %v176_v5 = vpop.f32.mrb[1].mxu0 }
 0x15c   :  { %v177_v6 = vadd.f32 %v4164_v0, %v176_v5 }
 0x15d   :  { %217 = vst.msk [vmem:[#allocation2 + $0x8] sm:$0xff] %vm215_vm3, %v182_v4 }
 0x15e   :  { %216 = vst.msk [vmem:[#allocation2] sm:$0xff] %vm215_vm3, %v177_v6  ;;  %296 = vrot.lane.b32.xlu0 %v177_v6, %s3944_s10  ;;  %232 = vrot.lane.b32.xlu1 %v177_v6, %s3945_s11 }
 0x162   :  { %49 = vperm.xlu0 %3809, %v32_v7   ;;  %264 = vrot.lane.b32.xlu1 %v177_v6, %s3946_s13 }
 0x165   :  { %v627_v13 = vld [vmem:[#allocation2] sm:$0xff] }
 0x166   :  { %55 = vperm.xlu0 %3809, %v34_v8   ;;  %46 = vperm.xlu1 %3810, %v31_v9   ;;  %v628_v15 = vadd.f32 %v627_v13, %v413_v58 }
 0x168   :  { %v2938_v16 = vmul.f32 -1.442695, %v628_v15 }
 0x16a   :  { %61 = vperm.xlu0 %3809, %v36_v10   ;;  %52 = vperm.xlu1 %3810, %v33_v11   ;;  %3811 = vpow2.f32 %v2938_v16  ;;  %v944_v10 = vld [vmem:[#allocation2 + $0x8] sm:$0xff] }
 0x16e   :  { %266 = vrot.lane.b32.xlu0 %v182_v4, %s3946_s13  ;;  %58 = vperm.xlu1 %3810, %v35_v12  }
 0x172   :  { %234 = vrot.lane.b32.xlu1 %v182_v4, %s3945_s11 }
 0x174   :  { %v3812_v22 = vpop.eup %3811 }
 0x175   :  { %v632_v26 = vadd.f32 1.0, %v3812_v22 }
 0x176   :  { %298 = vrot.lane.b32.xlu1 %v182_v4, %s3944_s10 }
 0x1d0   :  { %v297_v17 = vpop.permute.xlu0 %296  ;;  %v233_v19 = vpop.permute.xlu1 %232 }
 0x1d1   :  { %320 = vst.msk [vmem:[#allocation5] sm:$0xff] %vm215_vm3, %v297_v17  ;;  %256 = vst.msk [vmem:[#allocation3] sm:$0xff] %vm215_vm3, %v233_v19 }
 0x1d4   :  { %v265_v21 = vpop.permute.xlu1 %264 }
 0x1d5   :  { %288 = vst.msk [vmem:[#allocation4] sm:$0xff] %vm215_vm3, %v265_v21 }
 0x1d8   :  { %v635_v24 = vld [vmem:[#allocation3] sm:$0xff] }
 0x1d9   :  { %v636_v25 = vadd.f32 %v635_v24, %v483_v60  ;;  %v646_v30 = vld [vmem:[#allocation5] sm:$0xff] }
 0x1da   :  { %v647_v32 = vadd.f32 %v646_v30, %v623_v1 }
 0x1db   :  { %v2939_v27 = vmul.f32 -1.442695, %v636_v25 }
 0x1dc   :  { %v643_v28 = vld [vmem:[#allocation4] sm:$0xff]  ;;  %v2940_v34 = vmul.f32 -1.442695, %v647_v32 }
 0x1dd   :  { %3813 = vpow2.f32 %v2939_v27  ;;  %v644_v31 = vadd.f32 %v643_v28, %v553_v62 }
 0x1de   :  { %3815 = vrcp.f32 %v632_v26 }
 0x1df   :  { %3817 = vtanh.f32 %v644_v31 }
 0x1e0   :  { %3819 = vpow2.f32 %v2940_v34 }
 0x1e1   :  { %v50_v33 = vpop.permute.xlu0 %49 }
 0x1e2   :  { %vm66_vm5 = vcmp.eq.s32.totalorder %v50_v33, %v4151_v54 }
 0x1e5   :  { %v56_v36 = vpop.permute.xlu0 %55  ;;  %v47_v37 = vpop.permute.xlu1 %46 }
 0x1e6   :  { %vm65_vm4 = vcmp.eq.s32.totalorder %v47_v37, %v4151_v54  ;;  %vm68_vm7 = vcmp.eq.s32.totalorder %v56_v36, %v4151_v54 }
 0x1e7   :  { %v3814_v38 = vpop.eup %3813  ;;  %3216 = vmatprep.mubr.msk.f32.mxu0 %vm65_vm4, %v3943_v56 }
 0x1e8   :  { %v3816_v39 = vpop.eup %3815  ;;  %v640_v40 = vadd.f32 1.0, %v3814_v38  ;;  %3217 = vmatmul.mubr.msk.f32.gmra.mrb[2].mxu0 %vm66_vm5, %v3943_v56 }
 0x1e9   :  { %v3818_v42 = vpop.eup %3817  ;;  %v62_v43 = vpop.permute.xlu0 %61 }
 0x1ea   :  { %v53_v44 = vpop.permute.xlu1 %52  ;;  %3821 = vrcp.f32 %v640_v40  ;;  %v655_v45 = vmul.f32 %v3818_v42, %v3816_v39  ;;  %vm70_vm9 = vcmp.eq.s32.totalorder %v62_v43, %v4151_v54  ;;  %v3820_v50 = vpop.eup %3819 }
 0x1eb   :  { %vm67_vm6 = vcmp.eq.s32.totalorder %v53_v44, %v4151_v54  ;;  %v651_v55 = vadd.f32 1.0, %v3820_v50 }
 0x1ec   :  { %3219 = vmatprep.mubr.msk.f32.mxu0 %vm67_vm6, %v3943_v56 }
 0x1ed   :  { %3220 = vmatmul.mubr.msk.f32.gmra.mrb[4].mxu0 %vm68_vm7, %v3943_v56  ;;  %v267_v47 = vpop.permute.xlu0 %266  ;;  %3823 = vrcp.f32 %v651_v55 }
 0x1ee   :  { %v59_v48 = vpop.permute.xlu1 %58  ;;  %289 = vst.msk [vmem:[#allocation4 + $0x8] sm:$0xff] %vm215_vm3, %v267_v47 }
 0x1ef   :  { %vm69_vm8 = vcmp.eq.s32.totalorder %v59_v48, %v4151_v54 }
 0x1f0   :  { %3222 = vmatprep.mubr.msk.f32.mxu0 %vm69_vm8, %v3943_v56 }
 0x1f1   :  { %3223 = vmatmul.mubr.msk.f32.gmra.mrb[6].mxu0 %vm70_vm9, %v3943_v56 }
 0x1f2   :  { %v235_v51 = vpop.permute.xlu1 %234  ;;  %3288 = vmatprep.mubr.msk.f32.mxu0 %vm3941_vm0, %v3942_v20 }
 0x1f3   :  { %257 = vst.msk [vmem:[#allocation3 + $0x8] sm:$0xff] %vm215_vm3, %v235_v51 }
 0x1f4   :  { %v3822_v53 = vpop.eup %3821 }
 0x1f5   :  { %v654_v57 = vmul.f32 0.0, %v3822_v53  ;;  %v962_v30 = vld [vmem:[#allocation4 + $0x8] sm:$0xff] }
 0x1f6   :  { %v299_v58 = vpop.permute.xlu1 %298 }
 0x1f7   :  { %321 = vst.msk [vmem:[#allocation5 + $0x8] sm:$0xff] %vm215_vm3, %v299_v58  ;;  %v4214_v59 = vadd.f32 %v655_v45, %v654_v57  ;;  %v3824_v54 = vpop.eup %3823 }
 0x1f9   :  { %3825 = vtanh.f32 %v4214_v59 }
 0x1fa   :  { %v953_v12 = vld [vmem:[#allocation3 + $0x8] sm:$0xff] }
 0x1fe   :  { %v966_v25 = vld [vmem:[#allocation5 + $0x8] sm:$0xff] }
 0x203   :  { %v3826_v56 = vpop.eup %3825 }
 0x204   :  { %v658_v60 = vmul.f32 %v3826_v56, %v3824_v54 }
 0x206   :  { %659 = vst.msk [vmem:[%s4515_s7] sm:$0xff] %vm215_vm3, %v658_v60  ;;  %3278 = vmatmul.mubr.msk.f32.vlgmr.msra.gmra.mrb[8].mxu1 %vm215_vm3, %v658_v60  ;;  %3289 = vmatmul.mubr.msk.f32.vlgmr.msra.gmra.mrb[8].mxu0 %vm215_vm3, %v658_v60 }
 0x207   :  { %3647 = vmatpush3.bf16.msra.mxu1 %v4099_v41  ;;  %3653 = vmatpush3.bf16.msra.mxu0 %v4125_v49 }
 0x208   :  { %3648 = vmatprep.subr.bf16.mxu1 %v3940_v14  ;;  %3654 = vmatprep.subr.bf16.mxu0 %v3940_v14 }
 0x209   :  { %3299 = vmatprep.mubr.msk.f32.mxu1 %vm3941_vm0, %v3942_v20  ;;  %3310 = vmatprep.mubr.msk.f32.mxu0 %vm3941_vm0, %v3942_v20 }
 0x20b   :  { %3650 = vmatpush3.bf16.msra.mxu1 %v4113_v46  ;;  %3656 = vmatpush3.bf16.msra.mxu0 %v4136_v52 }
 0x20c   :  { %3657 = vmatprep.subr.bf16.mxu1 %v3940_v14  ;;  %3663 = vmatprep.subr.bf16.mxu0 %v3940_v14 }
 0x20e   :  { %3300 = vmatmul.mubr.msk.f32.vlgmr.msra.gmra.mrb[10].mxu1 %vm215_vm3, %v658_v60  ;;  %3311 = vmatmul.mubr.msk.f32.vlgmr.msra.gmra.mrb[10].mxu0 %vm215_vm3, %v658_v60 }
 0x20f   :  { %3659 = vmatpush3.bf16.msra.mxu1 %v4037_v18  ;;  %3665 = vmatpush3.bf16.msra.mxu0 %v4064_v29 }
 0x210   :  { %3660 = vmatprep.subr.bf16.mxu1 %v3940_v14  ;;  %3666 = vmatprep.subr.bf16.mxu0 %v3940_v14 }
 0x211   :  { %3321 = vmatprep.mubr.msk.f32.mxu1 %vm3941_vm0, %v3942_v20  ;;  %3332 = vmatprep.mubr.msk.f32.mxu0 %vm3941_vm0, %v3942_v20 }
 0x213   :  { %3662 = vmatpush3.bf16.msra.mxu1 %v4048_v23  ;;  %3668 = vmatpush3.bf16.msra.mxu0 %v4081_v35 }
 0x214   :  { %3669 = vmatprep.subr.bf16.mxu1 %v3940_v14  ;;  %3675 = vmatprep.subr.bf16.mxu0 %v3940_v14 }
 0x2bb   :  { %v3218_v61 = vpop.f32.mrb[2].mxu0 }
 0x2bc   :  { %v192_v62 = vadd.f32 %v3218_v61, %v4164_v0  ;;  %v186_v63 = vpop.f32.mrb[3].mxu0 }
 0x2bd   :  { %v187_v1 = vadd.f32 %v4164_v0, %v186_v63 }
 0x2be   :  { %219 = vst.msk [vmem:[#allocation2 + $0x18] sm:$0xff] %vm215_vm3, %v192_v62 }
 0x2bf   :  { %218 = vst.msk [vmem:[#allocation2 + $0x10] sm:$0xff] %vm215_vm3, %v187_v1  ;;  %268 = vrot.lane.b32.xlu1 %v187_v1, %s3946_s13  ;;  %236 = vrot.lane.b32.xlu0 %v187_v1, %s3945_s11 }
 0x2c0   :  { %v3221_v2 = vpop.f32.mrb[4].mxu0 }
 0x2c1   :  { %v202_v3 = vadd.f32 %v3221_v2, %v4164_v0  ;;  %v196_v4 = vpop.f32.mrb[5].mxu0 }
 0x2c2   :  { %v197_v5 = vadd.f32 %v4164_v0, %v196_v4 }
 0x2c3   :  { %221 = vst.msk [vmem:[#allocation2 + $0x28] sm:$0xff] %vm215_vm3, %v202_v3  ;;  %238 = vrot.lane.b32.xlu1 %v192_v62, %s3945_s11  ;;  %300 = vrot.lane.b32.xlu0 %v187_v1, %s3944_s10 }
 0x2c4   :  { %220 = vst.msk [vmem:[#allocation2 + $0x20] sm:$0xff] %vm215_vm3, %v197_v5  ;;  %v3224_v6 = vpop.f32.mrb[6].mxu0 }
 0x2c5   :  { %v212_v7 = vadd.f32 %v3224_v6, %v4164_v0  ;;  %v206_v8 = vpop.f32.mrb[7].mxu0 }
 0x2c6   :  { %v207_v9 = vadd.f32 %v4164_v0, %v206_v8 }
 0x2c7   :  { %223 = vst.msk [vmem:[#allocation2 + $0x38] sm:$0xff] %vm215_vm3, %v212_v7  ;;  %302 = vrot.lane.b32.xlu1 %v192_v62, %s3944_s10  ;;  %270 = vrot.lane.b32.xlu0 %v192_v62, %s3946_s13 }
 0x2c8   :  { %222 = vst.msk [vmem:[#allocation2 + $0x30] sm:$0xff] %vm215_vm3, %v207_v9 }
 0x2cb   :  { %272 = vrot.lane.b32.xlu1 %v197_v5, %s3946_s13  ;;  %240 = vrot.lane.b32.xlu0 %v197_v5, %s3945_s11 }
 0x2cf   :  { %242 = vrot.lane.b32.xlu1 %v202_v3, %s3945_s11  ;;  %304 = vrot.lane.b32.xlu0 %v197_v5, %s3944_s10 }
 0x2d3   :  { %306 = vrot.lane.b32.xlu1 %v202_v3, %s3944_s10  ;;  %274 = vrot.lane.b32.xlu0 %v202_v3, %s3946_s13 }
 0x2d7   :  { %276 = vrot.lane.b32.xlu1 %v207_v9, %s3946_s13  ;;  %244 = vrot.lane.b32.xlu0 %v207_v9, %s3945_s11 }
 0x2d9   :  { %v729_v0 = vpop.f32.mrb[8].mxu1  ;;  %v799_v11 = vpop.f32.mrb[8].mxu0 }
 0x2da   :  { %v945_v13 = vadd.f32 %v944_v10, %v729_v0  ;;  %v954_v15 = vadd.f32 %v953_v12, %v799_v11  ;;  %v3279_v16 = vpop.f32.mrb[9].mxu1  ;;  %v3290_v17 = vpop.f32.mrb[9].mxu0 }
 0x2db   :  { %246 = vrot.lane.b32.xlu1 %v212_v7, %s3945_s11  ;;  %308 = vrot.lane.b32.xlu0 %v207_v9, %s3944_s10  ;;  %v1265_v9 = vld [vmem:[#allocation2 + $0x10] sm:$0xff] }
 0x2dc   :  { %v2945_v19 = vmul.f32 -1.442695, %v945_v13  ;;  %v2946_v21 = vmul.f32 -1.442695, %v954_v15 }
 0x2de   :  { %3827 = vpow2.f32 %v2945_v19 }
 0x2df   :  { %3829 = vpow2.f32 %v2946_v21  ;;  %310 = vrot.lane.b32.xlu1 %v212_v7, %s3944_s10  ;;  %278 = vrot.lane.b32.xlu0 %v212_v7, %s3946_s13 }
 0x2e1   :  { %v869_v22 = vpop.f32.mrb[10].mxu1  ;;  %v939_v24 = vpop.f32.mrb[10].mxu0 }
 0x2e2   :  { %v967_v26 = vadd.f32 %v966_v25, %v939_v24  ;;  %v3301_v27 = vpop.f32.mrb[11].mxu1  ;;  %v3312_v28 = vpop.f32.mrb[11].mxu0  ;;  %v963_v32 = vadd.f32 %v962_v30, %v869_v22 }
 0x2e4   :  { %v2947_v31 = vmul.f32 -1.442695, %v967_v26 }
 0x2e6   :  { %3831 = vpow2.f32 %v2947_v31 }
 0x2e7   :  { %3833 = vtanh.f32 %v963_v32 }
 0x2e8   :  { %v3828_v33 = vpop.eup %3827 }
 0x2e9   :  { %v3830_v34 = vpop.eup %3829  ;;  %v949_v36 = vadd.f32 1.0, %v3828_v33 }
 0x2ea   :  { %v958_v37 = vadd.f32 1.0, %v3830_v34 }
 0x2eb   :  { %3835 = vrcp.f32 %v949_v36 }
 0x2ec   :  { %3837 = vrcp.f32 %v958_v37 }
 0x2f0   :  { %v3832_v38 = vpop.eup %3831 }
 0x2f1   :  { %v3834_v39 = vpop.eup %3833  ;;  %v971_v44 = vadd.f32 1.0, %v3832_v38 }
 0x2f3   :  { %3839 = vrcp.f32 %v971_v44 }
 0x2f5   :  { %v3836_v40 = vpop.eup %3835 }
 0x2f6   :  { %v3838_v42 = vpop.eup %3837  ;;  %v975_v43 = vmul.f32 %v3836_v40, %v3834_v39 }
 0x2f7   :  { %v974_v45 = vmul.f32 %v3838_v42, %v4214_v59 }
 0x2f9   :  { %v4280_v47 = vadd.f32 %v975_v43, %v974_v45 }
 0x2fb   :  { %3841 = vtanh.f32 %v4280_v47 }
 0x2fd   :  { %v3840_v48 = vpop.eup %3839 }
 0x305   :  { %v3842_v50 = vpop.eup %3841 }
 0x306   :  { %v978_v51 = vmul.f32 %v3842_v50, %v3840_v48 }
 0x308   :  { %2948 = vst.msk [vmem:[%s4515_s7 + $0x8] sm:$0xff] %vm215_vm3, %v978_v51  ;;  %3322 = vmatmul.mubr.msk.f32.vlgmr.msra.gmra.mrb[12].mxu1 %vm215_vm3, %v978_v51  ;;  %3333 = vmatmul.mubr.msk.f32.vlgmr.msra.gmra.mrb[12].mxu0 %vm215_vm3, %v978_v51 }
 0x309   :  { %3671 = vmatpush3.bf16.msra.mxu1 %v4099_v41  ;;  %3677 = vmatpush3.bf16.msra.mxu0 %v4125_v49 }
 0x30a   :  { %3672 = vmatprep.subr.bf16.mxu1 %v3940_v14  ;;  %3678 = vmatprep.subr.bf16.mxu0 %v3940_v14 }
 0x30b   :  { %3343 = vmatprep.mubr.msk.f32.mxu1 %vm3941_vm0, %v3942_v20  ;;  %3354 = vmatprep.mubr.msk.f32.mxu0 %vm3941_vm0, %v3942_v20 }
 0x30d   :  { %3674 = vmatpush3.bf16.msra.mxu1 %v4113_v46  ;;  %3680 = vmatpush3.bf16.msra.mxu0 %v4136_v52 }
 0x30e   :  { %3681 = vmatprep.subr.bf16.mxu1 %v3940_v14  ;;  %3687 = vmatprep.subr.bf16.mxu0 %v3940_v14 }
 0x310   :  { %3344 = vmatmul.mubr.msk.f32.vlgmr.msra.gmra.mrb[14].mxu1 %vm215_vm3, %v978_v51  ;;  %3355 = vmatmul.mubr.msk.f32.vlgmr.msra.gmra.mrb[14].mxu0 %vm215_vm3, %v978_v51  ;;  %v1586_v51 = vld [vmem:[#allocation2 + $0x18] sm:$0xff] }
 0x311   :  { %3683 = vmatpush3.bf16.msra.mxu1 %v4037_v18  ;;  %3689 = vmatpush3.bf16.msra.mxu0 %v4064_v29 }
 0x312   :  { %3684 = vmatprep.subr.bf16.mxu1 %v3940_v14  ;;  %3690 = vmatprep.subr.bf16.mxu0 %v3940_v14 }
 0x313   :  { %3365 = vmatprep.mubr.msk.f32.mxu1 %vm3941_vm0, %v3942_v20  ;;  %3376 = vmatprep.mubr.msk.f32.mxu0 %vm3941_vm0, %v3942_v20 }
 0x315   :  { %3686 = vmatpush3.bf16.msra.mxu1 %v4048_v23  ;;  %3692 = vmatpush3.bf16.msra.mxu0 %v4081_v35 }
 0x316   :  { %3693 = vmatprep.subr.bf16.mxu1 %v3940_v14  ;;  %3699 = vmatprep.subr.bf16.mxu0 %v3940_v14 }
 0x331   :  { %v237_v53 = vpop.permute.xlu0 %236  ;;  %v269_v55 = vpop.permute.xlu1 %268 }
 0x332   :  { %258 = vst.msk [vmem:[#allocation3 + $0x10] sm:$0xff] %vm215_vm3, %v237_v53  ;;  %290 = vst.msk [vmem:[#allocation4 + $0x10] sm:$0xff] %vm215_vm3, %v269_v55 }
 0x335   :  { %v301_v57 = vpop.permute.xlu0 %300  ;;  %v239_v58 = vpop.permute.xlu1 %238 }
 0x336   :  { %322 = vst.msk [vmem:[#allocation5 + $0x10] sm:$0xff] %vm215_vm3, %v301_v57  ;;  %259 = vst.msk [vmem:[#allocation3 + $0x18] sm:$0xff] %vm215_vm3, %v239_v58 }
 0x339   :  { %v271_v59 = vpop.permute.xlu0 %270  ;;  %v303_v54 = vpop.permute.xlu1 %302  ;;  %v1274_v10 = vld [vmem:[#allocation3 + $0x10] sm:$0xff] }
 0x33a   :  { %291 = vst.msk [vmem:[#allocation4 + $0x18] sm:$0xff] %vm215_vm3, %v271_v59  ;;  %323 = vst.msk [vmem:[#allocation5 + $0x18] sm:$0xff] %vm215_vm3, %v303_v54  ;;  %v1283_v27 = vld [vmem:[#allocation4 + $0x10] sm:$0xff] }
 0x33d   :  { %v241_v56 = vpop.permute.xlu0 %240  ;;  %v273_v60 = vpop.permute.xlu1 %272  ;;  %v1287_v22 = vld [vmem:[#allocation5 + $0x10] sm:$0xff]  ;;  %v1595_v55 = vld [vmem:[#allocation3 + $0x18] sm:$0xff] }
 0x33e   :  { %260 = vst.msk [vmem:[#allocation3 + $0x20] sm:$0xff] %vm215_vm3, %v241_v56  ;;  %292 = vst.msk [vmem:[#allocation4 + $0x20] sm:$0xff] %vm215_vm3, %v273_v60 }
 0x341   :  { %v305_v61 = vpop.permute.xlu0 %304  ;;  %v243_v62 = vpop.permute.xlu1 %242 }
 0x342   :  { %324 = vst.msk [vmem:[#allocation5 + $0x20] sm:$0xff] %vm215_vm3, %v305_v61  ;;  %261 = vst.msk [vmem:[#allocation3 + $0x28] sm:$0xff] %vm215_vm3, %v243_v62 }
 0x345   :  { %v275_v63 = vpop.permute.xlu0 %274  ;;  %v307_v1 = vpop.permute.xlu1 %306 }
 0x346   :  { %293 = vst.msk [vmem:[#allocation4 + $0x28] sm:$0xff] %vm215_vm3, %v275_v63  ;;  %325 = vst.msk [vmem:[#allocation5 + $0x28] sm:$0xff] %vm215_vm3, %v307_v1  ;;  %v1608_v63 = vld [vmem:[#allocation5 + $0x18] sm:$0xff] }
 0x349   :  { %v245_v2 = vpop.permute.xlu0 %244  ;;  %v277_v3 = vpop.permute.xlu1 %276 }
 0x34a   :  { %262 = vst.msk [vmem:[#allocation3 + $0x30] sm:$0xff] %vm215_vm3, %v245_v2  ;;  %294 = vst.msk [vmem:[#allocation4 + $0x30] sm:$0xff] %vm215_vm3, %v277_v3 }
 0x34d   :  { %v309_v4 = vpop.permute.xlu0 %308  ;;  %v247_v5 = vpop.permute.xlu1 %246 }
 0x34e   :  { %326 = vst.msk [vmem:[#allocation5 + $0x30] sm:$0xff] %vm215_vm3, %v309_v4  ;;  %263 = vst.msk [vmem:[#allocation3 + $0x38] sm:$0xff] %vm215_vm3, %v247_v5  ;;  %v1604_v4 = vld [vmem:[#allocation4 + $0x18] sm:$0xff] }
 0x351   :  { %v279_v6 = vpop.permute.xlu0 %278  ;;  %v311_v7 = vpop.permute.xlu1 %310 }
 0x352   :  { %295 = vst.msk [vmem:[#allocation4 + $0x38] sm:$0xff] %vm215_vm3, %v279_v6  ;;  %327 = vst.msk [vmem:[#allocation5 + $0x38] sm:$0xff] %vm215_vm3, %v311_v7 }
 0x3db   :  { %v1050_v8 = vpop.f32.mrb[12].mxu1  ;;  %v1120_v0 = vpop.f32.mrb[12].mxu0 }
 0x3dc   :  { %v1266_v11 = vadd.f32 %v1265_v9, %v1050_v8  ;;  %v1275_v12 = vadd.f32 %v1274_v10, %v1120_v0  ;;  %v3323_v13 = vpop.f32.mrb[13].mxu1  ;;  %v3334_v15 = vpop.f32.mrb[13].mxu0 }
 0x3de   :  { %v2953_v16 = vmul.f32 -1.442695, %v1266_v11  ;;  %v2954_v17 = vmul.f32 -1.442695, %v1275_v12 }
 0x3e0   :  { %3843 = vpow2.f32 %v2953_v16 }
 0x3e1   :  { %3845 = vpow2.f32 %v2954_v17 }
 0x3e3   :  { %v1190_v19 = vpop.f32.mrb[14].mxu1  ;;  %v1260_v21 = vpop.f32.mrb[14].mxu0 }
 0x3e4   :  { %v1288_v24 = vadd.f32 %v1287_v22, %v1260_v21  ;;  %v3345_v25 = vpop.f32.mrb[15].mxu1  ;;  %v3356_v26 = vpop.f32.mrb[15].mxu0  ;;  %v1284_v30 = vadd.f32 %v1283_v27, %v1190_v19 }
 0x3e5   :  { %v1907_v26 = vld [vmem:[#allocation2 + $0x20] sm:$0xff] }
 0x3e6   :  { %v2955_v28 = vmul.f32 -1.442695, %v1288_v24 }
 0x3e8   :  { %3847 = vpow2.f32 %v2955_v28  ;;  %v1916_v28 = vld [vmem:[#allocation3 + $0x20] sm:$0xff] }
 0x3e9   :  { %3849 = vtanh.f32 %v1284_v30 }
 0x3ea   :  { %v3844_v31 = vpop.eup %3843 }
 0x3eb   :  { %v3846_v32 = vpop.eup %3845  ;;  %v1270_v33 = vadd.f32 1.0, %v3844_v31 }
 0x3ec   :  { %v1279_v34 = vadd.f32 1.0, %v3846_v32 }
 0x3ed   :  { %3851 = vrcp.f32 %v1270_v33 }
 0x3ee   :  { %3853 = vrcp.f32 %v1279_v34 }
 0x3f2   :  { %v3848_v36 = vpop.eup %3847 }
 0x3f3   :  { %v3850_v37 = vpop.eup %3849  ;;  %v1292_v42 = vadd.f32 1.0, %v3848_v36 }
 0x3f5   :  { %3855 = vrcp.f32 %v1292_v42 }
 0x3f7   :  { %v3852_v38 = vpop.eup %3851 }
 0x3f8   :  { %v3854_v39 = vpop.eup %3853  ;;  %v1296_v40 = vmul.f32 %v3852_v38, %v3850_v37 }
 0x3f9   :  { %v1295_v43 = vmul.f32 %v3854_v39, %v4280_v47  ;;  %v1929_v39 = vld [vmem:[#allocation5 + $0x20] sm:$0xff] }
 0x3fb   :  { %v4334_v44 = vadd.f32 %v1296_v40, %v1295_v43 }
 0x3fd   :  { %3857 = vtanh.f32 %v4334_v44 }
 0x3ff   :  { %v3856_v45 = vpop.eup %3855 }
 0x407   :  { %v3858_v48 = vpop.eup %3857 }
 0x408   :  { %v1299_v50 = vmul.f32 %v3858_v48, %v3856_v45 }
 0x40a   :  { %2956 = vst.msk [vmem:[%s4515_s7 + $0x10] sm:$0xff] %vm215_vm3, %v1299_v50  ;;  %3366 = vmatmul.mubr.msk.f32.vlgmr.msra.gmra.mrb[16].mxu1 %vm215_vm3, %v1299_v50  ;;  %3377 = vmatmul.mubr.msk.f32.vlgmr.msra.gmra.mrb[16].mxu0 %vm215_vm3, %v1299_v50 }
 0x40b   :  { %3695 = vmatpush3.bf16.msra.mxu1 %v4099_v41  ;;  %3701 = vmatpush3.bf16.msra.mxu0 %v4125_v49 }
 0x40c   :  { %3696 = vmatprep.subr.bf16.mxu1 %v3940_v14  ;;  %3702 = vmatprep.subr.bf16.mxu0 %v3940_v14 }
 0x40d   :  { %3387 = vmatprep.mubr.msk.f32.mxu1 %vm3941_vm0, %v3942_v20  ;;  %3398 = vmatprep.mubr.msk.f32.mxu0 %vm3941_vm0, %v3942_v20 }
 0x40f   :  { %3698 = vmatpush3.bf16.msra.mxu1 %v4113_v46  ;;  %3704 = vmatpush3.bf16.msra.mxu0 %v4136_v52 }
 0x410   :  { %3705 = vmatprep.subr.bf16.mxu1 %v3940_v14  ;;  %3711 = vmatprep.subr.bf16.mxu0 %v3940_v14 }
 0x412   :  { %3388 = vmatmul.mubr.msk.f32.vlgmr.msra.gmra.mrb[18].mxu1 %vm215_vm3, %v1299_v50  ;;  %3399 = vmatmul.mubr.msk.f32.vlgmr.msra.gmra.mrb[18].mxu0 %vm215_vm3, %v1299_v50 }
 0x413   :  { %3707 = vmatpush3.bf16.msra.mxu1 %v4037_v18  ;;  %3713 = vmatpush3.bf16.msra.mxu0 %v4064_v29 }
 0x414   :  { %3708 = vmatprep.subr.bf16.mxu1 %v3940_v14  ;;  %3714 = vmatprep.subr.bf16.mxu0 %v3940_v14 }
 0x415   :  { %3409 = vmatprep.mubr.msk.f32.mxu1 %vm3941_vm0, %v3942_v20  ;;  %3420 = vmatprep.mubr.msk.f32.mxu0 %vm3941_vm0, %v3942_v20 }
 0x417   :  { %3710 = vmatpush3.bf16.msra.mxu1 %v4048_v23  ;;  %3716 = vmatpush3.bf16.msra.mxu0 %v4081_v35 }
 0x418   :  { %3717 = vmatprep.subr.bf16.mxu1 %v3940_v14  ;;  %3723 = vmatprep.subr.bf16.mxu0 %v3940_v14 }
 0x4dd   :  { %v1371_v47 = vpop.f32.mrb[16].mxu1  ;;  %v1441_v53 = vpop.f32.mrb[16].mxu0 }
 0x4de   :  { %v1587_v57 = vadd.f32 %v1586_v51, %v1371_v47  ;;  %v1596_v58 = vadd.f32 %v1595_v55, %v1441_v53  ;;  %v3367_v59 = vpop.f32.mrb[17].mxu1  ;;  %v3378_v54 = vpop.f32.mrb[17].mxu0 }
 0x4e0   :  { %v2961_v56 = vmul.f32 -1.442695, %v1587_v57  ;;  %v2962_v60 = vmul.f32 -1.442695, %v1596_v58 }
 0x4e2   :  { %3859 = vpow2.f32 %v2961_v56 }
 0x4e3   :  { %3861 = vpow2.f32 %v2962_v60 }
 0x4e5   :  { %v1511_v61 = vpop.f32.mrb[18].mxu1  ;;  %v1581_v62 = vpop.f32.mrb[18].mxu0 }
 0x4e6   :  { %v1609_v1 = vadd.f32 %v1608_v63, %v1581_v62  ;;  %v3389_v2 = vpop.f32.mrb[19].mxu1  ;;  %v3400_v3 = vpop.f32.mrb[19].mxu0  ;;  %v1605_v6 = vadd.f32 %v1604_v4, %v1511_v61 }
 0x4e7   :  { %v2228_v3 = vld [vmem:[#allocation2 + $0x28] sm:$0xff] }
 0x4e8   :  { %v2963_v5 = vmul.f32 -1.442695, %v1609_v1 }
 0x4ea   :  { %3863 = vpow2.f32 %v2963_v5  ;;  %v2237_v5 = vld [vmem:[#allocation3 + $0x28] sm:$0xff] }
 0x4eb   :  { %3865 = vtanh.f32 %v1605_v6 }
 0x4ec   :  { %v3860_v7 = vpop.eup %3859 }
 0x4ed   :  { %v3862_v8 = vpop.eup %3861  ;;  %v1591_v9 = vadd.f32 1.0, %v3860_v7 }
 0x4ee   :  { %v1600_v0 = vadd.f32 1.0, %v3862_v8 }
 0x4ef   :  { %3867 = vrcp.f32 %v1591_v9 }
 0x4f0   :  { %3869 = vrcp.f32 %v1600_v0 }
 0x4f4   :  { %v3864_v10 = vpop.eup %3863 }
 0x4f5   :  { %v3866_v11 = vpop.eup %3865  ;;  %v1613_v16 = vadd.f32 1.0, %v3864_v10 }
 0x4f7   :  { %3871 = vrcp.f32 %v1613_v16 }
 0x4f9   :  { %v3868_v12 = vpop.eup %3867 }
 0x4fa   :  { %v3870_v13 = vpop.eup %3869  ;;  %v1617_v15 = vmul.f32 %v3868_v12, %v3866_v11 }
 0x4fb   :  { %v1616_v17 = vmul.f32 %v3870_v13, %v4334_v44  ;;  %v1925_v44 = vld [vmem:[#allocation4 + $0x20] sm:$0xff]  ;;  %v2250_v13 = vld [vmem:[#allocation5 + $0x28] sm:$0xff] }
 0x4fd   :  { %v4370_v19 = vadd.f32 %v1617_v15, %v1616_v17 }
 0x4ff   :  { %3873 = vtanh.f32 %v4370_v19 }
 0x501   :  { %v3872_v21 = vpop.eup %3871 }
 0x509   :  { %v3874_v22 = vpop.eup %3873 }
 0x50a   :  { %v1620_v24 = vmul.f32 %v3874_v22, %v3872_v21 }
 0x50c   :  { %2964 = vst.msk [vmem:[%s4515_s7 + $0x18] sm:$0xff] %vm215_vm3, %v1620_v24  ;;  %3410 = vmatmul.mubr.msk.f32.vlgmr.msra.gmra.mrb[20].mxu1 %vm215_vm3, %v1620_v24  ;;  %3421 = vmatmul.mubr.msk.f32.vlgmr.msra.gmra.mrb[20].mxu0 %vm215_vm3, %v1620_v24 }
 0x50d   :  { %3719 = vmatpush3.bf16.msra.mxu1 %v4099_v41  ;;  %3725 = vmatpush3.bf16.msra.mxu0 %v4125_v49 }
 0x50e   :  { %3720 = vmatprep.subr.bf16.mxu1 %v3940_v14  ;;  %3726 = vmatprep.subr.bf16.mxu0 %v3940_v14 }
 0x50f   :  { %3431 = vmatprep.mubr.msk.f32.mxu1 %vm3941_vm0, %v3942_v20  ;;  %3442 = vmatprep.mubr.msk.f32.mxu0 %vm3941_vm0, %v3942_v20 }
 0x511   :  { %3722 = vmatpush3.bf16.msra.mxu1 %v4113_v46  ;;  %3728 = vmatpush3.bf16.msra.mxu0 %v4136_v52 }
 0x512   :  { %3729 = vmatprep.subr.bf16.mxu1 %v3940_v14  ;;  %3735 = vmatprep.subr.bf16.mxu0 %v3940_v14 }
 0x514   :  { %3432 = vmatmul.mubr.msk.f32.vlgmr.msra.gmra.mrb[22].mxu1 %vm215_vm3, %v1620_v24  ;;  %3443 = vmatmul.mubr.msk.f32.vlgmr.msra.gmra.mrb[22].mxu0 %vm215_vm3, %v1620_v24 }
 0x515   :  { %3731 = vmatpush3.bf16.msra.mxu1 %v4037_v18  ;;  %3737 = vmatpush3.bf16.msra.mxu0 %v4064_v29 }
 0x516   :  { %3732 = vmatprep.subr.bf16.mxu1 %v3940_v14  ;;  %3738 = vmatprep.subr.bf16.mxu0 %v3940_v14 }
 0x517   :  { %3453 = vmatprep.mubr.msk.f32.mxu1 %vm3941_vm0, %v3942_v20  ;;  %3464 = vmatprep.mubr.msk.f32.mxu0 %vm3941_vm0, %v3942_v20 }
 0x519   :  { %3734 = vmatpush3.bf16.msra.mxu1 %v4048_v23  ;;  %3740 = vmatpush3.bf16.msra.mxu0 %v4081_v35 }
 0x51a   :  { %3741 = vmatprep.subr.bf16.mxu1 %v3940_v14  ;;  %3747 = vmatprep.subr.bf16.mxu0 %v3940_v14 }
 0x5df   :  { %v1692_v25 = vpop.f32.mrb[20].mxu1  ;;  %v1762_v27 = vpop.f32.mrb[20].mxu0 }
 0x5e0   :  { %v1908_v30 = vadd.f32 %v1907_v26, %v1692_v25  ;;  %v1917_v31 = vadd.f32 %v1916_v28, %v1762_v27  ;;  %v3411_v32 = vpop.f32.mrb[21].mxu1  ;;  %v3422_v33 = vpop.f32.mrb[21].mxu0 }
 0x5e2   :  { %v2969_v34 = vmul.f32 -1.442695, %v1908_v30  ;;  %v2970_v36 = vmul.f32 -1.442695, %v1917_v31 }
 0x5e4   :  { %3875 = vpow2.f32 %v2969_v34 }
 0x5e5   :  { %3877 = vpow2.f32 %v2970_v36 }
 0x5e7   :  { %v1832_v37 = vpop.f32.mrb[22].mxu1  ;;  %v1902_v38 = vpop.f32.mrb[22].mxu0 }
 0x5e8   :  { %v1930_v40 = vadd.f32 %v1929_v39, %v1902_v38  ;;  %v3433_v42 = vpop.f32.mrb[23].mxu1  ;;  %v3444_v43 = vpop.f32.mrb[23].mxu0  ;;  %v1926_v48 = vadd.f32 %v1925_v44, %v1832_v37 }
 0x5e9   :  { %v2558_v43 = vld [vmem:[#allocation3 + $0x30] sm:$0xff] }
 0x5ea   :  { %v2971_v45 = vmul.f32 -1.442695, %v1930_v40 }
 0x5ec   :  { %3879 = vpow2.f32 %v2971_v45 }
 0x5ed   :  { %3881 = vtanh.f32 %v1926_v48 }
 0x5ee   :  { %v3876_v50 = vpop.eup %3875 }
 0x5ef   :  { %v3878_v47 = vpop.eup %3877  ;;  %v1912_v51 = vadd.f32 1.0, %v3876_v50 }
 0x5f0   :  { %v1921_v53 = vadd.f32 1.0, %v3878_v47 }
 0x5f1   :  { %3883 = vrcp.f32 %v1912_v51 }
 0x5f2   :  { %3885 = vrcp.f32 %v1921_v53 }
 0x5f6   :  { %v3880_v55 = vpop.eup %3879 }
 0x5f7   :  { %v3882_v57 = vpop.eup %3881  ;;  %v1934_v56 = vadd.f32 1.0, %v3880_v55  ;;  %v2571_v55 = vld [vmem:[#allocation5 + $0x30] sm:$0xff] }
 0x5f9   :  { %3887 = vrcp.f32 %v1934_v56 }
 0x5fb   :  { %v3884_v58 = vpop.eup %3883 }
 0x5fc   :  { %v3886_v59 = vpop.eup %3885  ;;  %v1938_v54 = vmul.f32 %v3884_v58, %v3882_v57 }
 0x5fd   :  { %v1937_v60 = vmul.f32 %v3886_v59, %v4370_v19  ;;  %v2246_v19 = vld [vmem:[#allocation4 + $0x28] sm:$0xff]  ;;  %v2567_v59 = vld [vmem:[#allocation4 + $0x30] sm:$0xff] }
 0x5ff   :  { %v4406_v61 = vadd.f32 %v1938_v54, %v1937_v60 }
 0x601   :  { %3889 = vtanh.f32 %v4406_v61 }
 0x603   :  { %v3888_v62 = vpop.eup %3887 }
 0x60b   :  { %v3890_v63 = vpop.eup %3889 }
 0x60c   :  { %v1941_v1 = vmul.f32 %v3890_v63, %v3888_v62 }
 0x60e   :  { %2972 = vst.msk [vmem:[%s4515_s7 + $0x20] sm:$0xff] %vm215_vm3, %v1941_v1  ;;  %3454 = vmatmul.mubr.msk.f32.vlgmr.msra.gmra.mrb[24].mxu1 %vm215_vm3, %v1941_v1  ;;  %3465 = vmatmul.mubr.msk.f32.vlgmr.msra.gmra.mrb[24].mxu0 %vm215_vm3, %v1941_v1 }
 0x60f   :  { %3743 = vmatpush3.bf16.msra.mxu1 %v4099_v41  ;;  %3749 = vmatpush3.bf16.msra.mxu0 %v4125_v49 }
 0x610   :  { %3744 = vmatprep.subr.bf16.mxu1 %v3940_v14  ;;  %3750 = vmatprep.subr.bf16.mxu0 %v3940_v14 }
 0x611   :  { %3475 = vmatprep.mubr.msk.f32.mxu1 %vm3941_vm0, %v3942_v20  ;;  %3486 = vmatprep.mubr.msk.f32.mxu0 %vm3941_vm0, %v3942_v20 }
 0x613   :  { %3746 = vmatpush3.bf16.msra.mxu1 %v4113_v46  ;;  %3752 = vmatpush3.bf16.msra.mxu0 %v4136_v52 }
 0x614   :  { %3753 = vmatprep.subr.bf16.mxu1 %v3940_v14  ;;  %3759 = vmatprep.subr.bf16.mxu0 %v3940_v14 }
 0x616   :  { %3476 = vmatmul.mubr.msk.f32.vlgmr.msra.gmra.mrb[26].mxu1 %vm215_vm3, %v1941_v1  ;;  %3487 = vmatmul.mubr.msk.f32.vlgmr.msra.gmra.mrb[26].mxu0 %vm215_vm3, %v1941_v1 }
 0x617   :  { %3755 = vmatpush3.bf16.msra.mxu1 %v4037_v18  ;;  %3761 = vmatpush3.bf16.msra.mxu0 %v4064_v29 }
 0x618   :  { %3756 = vmatprep.subr.bf16.mxu1 %v3940_v14  ;;  %3762 = vmatprep.subr.bf16.mxu0 %v3940_v14 }
 0x619   :  { %3497 = vmatprep.mubr.msk.f32.mxu1 %vm3941_vm0, %v3942_v20  ;;  %3508 = vmatprep.mubr.msk.f32.mxu0 %vm3941_vm0, %v3942_v20 }
 0x61b   :  { %3758 = vmatpush3.bf16.msra.mxu1 %v4048_v23  ;;  %3764 = vmatpush3.bf16.msra.mxu0 %v4081_v35 }
 0x61c   :  { %3765 = vmatprep.subr.bf16.mxu1 %v3940_v14  ;;  %3771 = vmatprep.subr.bf16.mxu0 %v3940_v14 }
 0x6e1   :  { %v2013_v2 = vpop.f32.mrb[24].mxu1  ;;  %v2083_v4 = vpop.f32.mrb[24].mxu0 }
 0x6e2   :  { %v2229_v6 = vadd.f32 %v2228_v3, %v2013_v2  ;;  %v2238_v7 = vadd.f32 %v2237_v5, %v2083_v4  ;;  %v3455_v8 = vpop.f32.mrb[25].mxu1  ;;  %v3466_v9 = vpop.f32.mrb[25].mxu0 }
 0x6e4   :  { %v2977_v0 = vmul.f32 -1.442695, %v2229_v6  ;;  %v2978_v10 = vmul.f32 -1.442695, %v2238_v7 }
 0x6e6   :  { %3891 = vpow2.f32 %v2977_v0 }
 0x6e7   :  { %3893 = vpow2.f32 %v2978_v10 }
 0x6e9   :  { %v2153_v11 = vpop.f32.mrb[26].mxu1  ;;  %v2223_v12 = vpop.f32.mrb[26].mxu0 }
 0x6ea   :  { %v2251_v15 = vadd.f32 %v2250_v13, %v2223_v12  ;;  %v3477_v16 = vpop.f32.mrb[27].mxu1  ;;  %v3488_v17 = vpop.f32.mrb[27].mxu0  ;;  %v2247_v22 = vadd.f32 %v2246_v19, %v2153_v11  ;;  %v2879_v12 = vld [vmem:[#allocation3 + $0x38] sm:$0xff] }
 0x6ec   :  { %v2979_v21 = vmul.f32 -1.442695, %v2251_v15 }
 0x6ee   :  { %3895 = vpow2.f32 %v2979_v21  ;;  %v2892_v21 = vld [vmem:[#allocation5 + $0x38] sm:$0xff] }
 0x6ef   :  { %3897 = vtanh.f32 %v2247_v22 }
 0x6f0   :  { %v3892_v24 = vpop.eup %3891 }
 0x6f1   :  { %v3894_v25 = vpop.eup %3893  ;;  %v2233_v26 = vadd.f32 1.0, %v3892_v24 }
 0x6f2   :  { %v2242_v27 = vadd.f32 1.0, %v3894_v25  ;;  %v2888_v25 = vld [vmem:[#allocation4 + $0x38] sm:$0xff] }
 0x6f3   :  { %3899 = vrcp.f32 %v2233_v26 }
 0x6f4   :  { %3901 = vrcp.f32 %v2242_v27 }
 0x6f8   :  { %v3896_v28 = vpop.eup %3895 }
 0x6f9   :  { %v3898_v30 = vpop.eup %3897  ;;  %v2255_v34 = vadd.f32 1.0, %v3896_v28 }
 0x6fb   :  { %3903 = vrcp.f32 %v2255_v34 }
 0x6fd   :  { %v3900_v31 = vpop.eup %3899 }
 0x6fe   :  { %v3902_v32 = vpop.eup %3901  ;;  %v2259_v33 = vmul.f32 %v3900_v31, %v3898_v30 }
 0x6ff   :  { %v2258_v36 = vmul.f32 %v3902_v32, %v4406_v61 }
 0x701   :  { %v4442_v37 = vadd.f32 %v2259_v33, %v2258_v36 }
 0x703   :  { %3905 = vtanh.f32 %v4442_v37 }
 0x705   :  { %v3904_v38 = vpop.eup %3903 }
 0x70d   :  { %v3906_v39 = vpop.eup %3905 }
 0x70e   :  { %v2262_v40 = vmul.f32 %v3906_v39, %v3904_v38 }
 0x710   :  { %2980 = vst.msk [vmem:[%s4515_s7 + $0x28] sm:$0xff] %vm215_vm3, %v2262_v40  ;;  %3498 = vmatmul.mubr.msk.f32.vlgmr.msra.gmra.mrb[28].mxu1 %vm215_vm3, %v2262_v40  ;;  %3509 = vmatmul.mubr.msk.f32.vlgmr.msra.gmra.mrb[28].mxu0 %vm215_vm3, %v2262_v40 }
 0x711   :  { %3767 = vmatpush3.bf16.msra.mxu1 %v4099_v41  ;;  %3773 = vmatpush3.bf16.msra.mxu0 %v4125_v49 }
 0x712   :  { %3768 = vmatprep.subr.bf16.mxu1 %v3940_v14  ;;  %3774 = vmatprep.subr.bf16.mxu0 %v3940_v14 }
 0x713   :  { %3519 = vmatprep.mubr.msk.f32.mxu1 %vm3941_vm0, %v3942_v20  ;;  %3530 = vmatprep.mubr.msk.f32.mxu0 %vm3941_vm0, %v3942_v20 }
 0x715   :  { %3770 = vmatpush3.bf16.msra.mxu1 %v4113_v46  ;;  %3776 = vmatpush3.bf16.msra.mxu0 %v4136_v52 }
 0x716   :  { %3777 = vmatprep.subr.bf16.mxu1 %v3940_v14  ;;  %3783 = vmatprep.subr.bf16.mxu0 %v3940_v14 }
 0x718   :  { %3520 = vmatmul.mubr.msk.f32.vlgmr.msra.gmra.mrb[30].mxu1 %vm215_vm3, %v2262_v40  ;;  %3531 = vmatmul.mubr.msk.f32.vlgmr.msra.gmra.mrb[30].mxu0 %vm215_vm3, %v2262_v40 }
 0x719   :  { %3779 = vmatpush3.bf16.msra.mxu1 %v4037_v18  ;;  %3785 = vmatpush3.bf16.msra.mxu0 %v4064_v29  ;;  %v2549_v29 = vld [vmem:[#allocation2 + $0x30] sm:$0xff] }
 0x71a   :  { %3780 = vmatprep.subr.bf16.mxu1 %v3940_v14  ;;  %3786 = vmatprep.subr.bf16.mxu0 %v3940_v14 }
 0x71b   :  { %3541 = vmatprep.mubr.msk.f32.mxu1 %vm3941_vm0, %v3942_v20  ;;  %3552 = vmatprep.mubr.msk.f32.mxu0 %vm3941_vm0, %v3942_v20 }
 0x71d   :  { %3782 = vmatpush3.bf16.msra.mxu1 %v4048_v23  ;;  %3788 = vmatpush3.bf16.msra.mxu0 %v4081_v35 }
 0x71e   :  { %3789 = vmatprep.subr.bf16.mxu1 %v3940_v14  ;;  %3795 = vmatprep.subr.bf16.mxu0 %v3940_v14 }
 0x7e3   :  { %v2334_v18 = vpop.f32.mrb[28].mxu1  ;;  %v2404_v42 = vpop.f32.mrb[28].mxu0 }
 0x7e4   :  { %v2550_v44 = vadd.f32 %v2549_v29, %v2334_v18  ;;  %v2559_v45 = vadd.f32 %v2558_v43, %v2404_v42  ;;  %v3499_v48 = vpop.f32.mrb[29].mxu1  ;;  %v3510_v50 = vpop.f32.mrb[29].mxu0 }
 0x7e6   :  { %v2985_v47 = vmul.f32 -1.442695, %v2550_v44  ;;  %v2986_v51 = vmul.f32 -1.442695, %v2559_v45 }
 0x7e8   :  { %3907 = vpow2.f32 %v2985_v47 }
 0x7e9   :  { %3909 = vpow2.f32 %v2986_v51 }
 0x7eb   :  { %v2474_v53 = vpop.f32.mrb[30].mxu1  ;;  %v2544_v23 = vpop.f32.mrb[30].mxu0 }
 0x7ec   :  { %v2572_v35 = vadd.f32 %v2571_v55, %v2544_v23  ;;  %v3521_v57 = vpop.f32.mrb[31].mxu1  ;;  %v3532_v58 = vpop.f32.mrb[31].mxu0  ;;  %v2568_v56 = vadd.f32 %v2567_v59, %v2474_v53 }
 0x7ee   :  { %v2987_v54 = vmul.f32 -1.442695, %v2572_v35 }
 0x7f0   :  { %3911 = vpow2.f32 %v2987_v54 }
 0x7f1   :  { %3913 = vtanh.f32 %v2568_v56 }
 0x7f2   :  { %v3908_v60 = vpop.eup %3907 }
 0x7f3   :  { %v3910_v61 = vpop.eup %3909  ;;  %v2554_v62 = vadd.f32 1.0, %v3908_v60 }
 0x7f4   :  { %v2563_v63 = vadd.f32 1.0, %v3910_v61 }
 0x7f5   :  { %3915 = vrcp.f32 %v2554_v62 }
 0x7f6   :  { %3917 = vrcp.f32 %v2563_v63 }
 0x7fa   :  { %v3912_v1 = vpop.eup %3911 }
 0x7fb   :  { %v3914_v2 = vpop.eup %3913  ;;  %v2576_v6 = vadd.f32 1.0, %v3912_v1 }
 0x7fd   :  { %3919 = vrcp.f32 %v2576_v6 }
 0x7ff   :  { %v3916_v3 = vpop.eup %3915 }
 0x800   :  { %v3918_v4 = vpop.eup %3917  ;;  %v2580_v5 = vmul.f32 %v3916_v3, %v3914_v2 }
 0x801   :  { %v2579_v7 = vmul.f32 %v3918_v4, %v4442_v37 }
 0x803   :  { %v2581_v8 = vadd.f32 %v2580_v5, %v2579_v7 }
 0x805   :  { %3921 = vtanh.f32 %v2581_v8 }
 0x807   :  { %v3920_v9 = vpop.eup %3919 }
 0x80f   :  { %v3922_v0 = vpop.eup %3921 }
 0x810   :  { %v2583_v10 = vmul.f32 %v3922_v0, %v3920_v9 }
 0x812   :  { %2988 = vst.msk [vmem:[%s4515_s7 + $0x30] sm:$0xff] %vm215_vm3, %v2583_v10  ;;  %3542 = vmatmul.mubr.msk.f32.vlgmr.msra.gmra.mrb[32].mxu1 %vm215_vm3, %v2583_v10  ;;  %3553 = vmatmul.mubr.msk.f32.vlgmr.msra.gmra.mrb[32].mxu0 %vm215_vm3, %v2583_v10 }
 0x813   :  { %3791 = vmatpush3.bf16.msra.mxu1 %v4099_v41  ;;  %3797 = vmatpush3.bf16.msra.mxu0 %v4125_v49  ;;  %v2870_v49 = vld [vmem:[#allocation2 + $0x38] sm:$0xff] }
 0x814   :  { %3792 = vmatprep.subr.bf16.mxu1 %v3940_v14  ;;  %3798 = vmatprep.subr.bf16.mxu0 %v3940_v14 }
 0x815   :  { %3563 = vmatprep.mubr.msk.f32.mxu1 %vm3941_vm0, %v3942_v20  ;;  %3574 = vmatprep.mubr.msk.f32.mxu0 %vm3941_vm0, %v3942_v20 }
 0x817   :  { %3794 = vmatpush3.bf16.msra.mxu1 %v4113_v46  ;;  %3800 = vmatpush3.bf16.msra.mxu0 %v4136_v52 }
 0x81a   :  { %3564 = vmatmul.mubr.msk.f32.vlgmr.msra.gmra.mrb[34].mxu1 %vm215_vm3, %v2583_v10  ;;  %3575 = vmatmul.mubr.msk.f32.vlgmr.msra.gmra.mrb[34].mxu0 %vm215_vm3, %v2583_v10 }
 0x8e5   :  { %v2655_v41 = vpop.f32.mrb[32].mxu1  ;;  %v2725_v11 = vpop.f32.mrb[32].mxu0 }
 0x8e6   :  { %v2871_v13 = vadd.f32 %v2870_v49, %v2655_v41  ;;  %v2880_v14 = vadd.f32 %v2879_v12, %v2725_v11  ;;  %v3543_v15 = vpop.f32.mrb[33].mxu1  ;;  %v3554_v16 = vpop.f32.mrb[33].mxu0 }
 0x8e8   :  { %v2993_v17 = vmul.f32 -1.442695, %v2871_v13  ;;  %v2994_v19 = vmul.f32 -1.442695, %v2880_v14 }
 0x8ea   :  { %3923 = vpow2.f32 %v2993_v17 }
 0x8eb   :  { %3925 = vpow2.f32 %v2994_v19 }
 0x8ed   :  { %v2795_v20 = vpop.f32.mrb[34].mxu1  ;;  %v2865_v46 = vpop.f32.mrb[34].mxu0 }
 0x8ee   :  { %v2893_v52 = vadd.f32 %v2892_v21, %v2865_v46  ;;  %v3565_v22 = vpop.f32.mrb[35].mxu1  ;;  %v3576_v24 = vpop.f32.mrb[35].mxu0  ;;  %v2889_v27 = vadd.f32 %v2888_v25, %v2795_v20 }
 0x8f0   :  { %v2995_v26 = vmul.f32 -1.442695, %v2893_v52 }
 0x8f2   :  { %3927 = vpow2.f32 %v2995_v26 }
 0x8f3   :  { %3929 = vtanh.f32 %v2889_v27 }
 0x8f4   :  { %v3924_v28 = vpop.eup %3923 }
 0x8f5   :  { %v3926_v30 = vpop.eup %3925  ;;  %v2875_v31 = vadd.f32 1.0, %v3924_v28 }
 0x8f6   :  { %v2884_v32 = vadd.f32 1.0, %v3926_v30 }
 0x8f7   :  { %3931 = vrcp.f32 %v2875_v31 }
 0x8f8   :  { %3933 = vrcp.f32 %v2884_v32 }
 0x8fc   :  { %v3928_v33 = vpop.eup %3927 }
 0x8fd   :  { %v3930_v34 = vpop.eup %3929  ;;  %v2897_v39 = vadd.f32 1.0, %v3928_v33 }
 0x8ff   :  { %3935 = vrcp.f32 %v2897_v39 }
 0x901   :  { %v3932_v36 = vpop.eup %3931 }
 0x902   :  { %v3934_v37 = vpop.eup %3933  ;;  %v2901_v38 = vmul.f32 %v3932_v36, %v3930_v34 }
 0x903   :  { %v2900_v40 = vmul.f32 %v3934_v37, %v2581_v8 }
 0x905   :  { %v2902_v18 = vadd.f32 %v2901_v38, %v2900_v40 }
 0x907   :  { %3937 = vtanh.f32 %v2902_v18  ;;  %2908 = vst.msk [vmem:[%s4516_s9] sm:$0xff] %vm215_vm3, %v2902_v18 }
 0x909   :  { %v3936_v29 = vpop.eup %3935 }
 0x911   :  { %v3938_v42 = vpop.eup %3937 }
 0x912   :  { %v2904_v43 = vmul.f32 %v3938_v42, %v3936_v29 }
 0x914   :  { %2996 = vst.msk [vmem:[%s4515_s7 + $0x38] sm:$0xff] %vm215_vm3, %v2904_v43  ;;  %2907 = vst.msk [vmem:[%s4517_s8] sm:$0xff] %vm215_vm3, %v2904_v43 }

</bundles_post_ra>
